<compile_context>
chip_gen: v7x
topology: tpu7x:2x2x1
jax: 0.10.0
libtpu: 0.0.40
codegen_flags: <defaults>
</compile_context>

<pallas_src>
import functools
from typing import NamedTuple, Tuple

import jax
import jax.numpy as jnp
from jax import lax
from jax.experimental import pallas as pl
from jax.experimental.pallas import tpu as pltpu


class C2fConfig(NamedTuple):
    cv1in: int
    cv1out: int
    split: Tuple[int, int]          # cv1_split_sections
    inner_cv1outs: Tuple[int, ...]
    inner_cv2outs: Tuple[int, ...]
    cv2out: int


def _pad8(c):
    return ((c + 7) // 8) * 8


# ----------------------------------------------------------------------------
# Fused C2fPruned kernel (built per static config)
# ----------------------------------------------------------------------------
def _make_c2f_kernel(cfg: C2fConfig, H: int, W: int):
    HW = H * W
    pad_off = W + 1                       # left halo of the padded row buffer
    n = len(cfg.inner_cv1outs)
    n_w = 4 + 4 * n                       # number of weight/bias operands
    cv1out_p = _pad8(cfg.cv1out)
    seg_p = [_pad8(c) for c in cfg.inner_cv2outs]
    cv2out = cfg.cv2out

    def kernel(*refs):
        x_ref = refs[0]
        wrefs = refs[1:1 + n_w]
        o_ref = refs[1 + n_w]
        cat_ref = refs[2 + n_w]           # VMEM (cat_p, HW) f32 concat buffer
        pad_ref = refs[3 + n_w]           # VMEM zero-padded row buffer

        # Zero once per image: only the halo columns ever stay zero, the
        # interior is overwritten by each 3x3 conv before it is read.
        pad_ref[...] = jnp.zeros(pad_ref.shape, pad_ref.dtype)

        # Column masks for the horizontal taps (row-wrap suppression).
        col = lax.broadcasted_iota(jnp.int32, (1, HW), 1) % W
        not_left = col >= 1               # valid for dx == -1
        not_right = col < (W - 1)         # valid for dx == +1

        def conv1x1(act, w_ref, b_ref):
            y = jnp.dot(w_ref[...], act.astype(jnp.bfloat16),
                        preferred_element_type=jnp.float32)
            y = y + b_ref[...]
            return y * jax.nn.sigmoid(y)  # SiLU

        def conv3x3(act, w_ref, b_ref):
            ci_p = act.shape[0]           # multiple of 8 == w_ref.shape[2]
            co_p = w_ref.shape[1]
            pad_ref[0:ci_p, pad_off:pad_off + HW] = act
            acc = jnp.zeros((co_p, HW), jnp.float32)
            t = 0
            for dy in (-1, 0, 1):
                for dx in (-1, 0, 1):
                    s = pad_off + dy * W + dx
                    sh = pad_ref[0:ci_p, s:s + HW]
                    if dx == -1:
                        sh = jnp.where(not_left, sh, 0.0)
                    elif dx == 1:
                        sh = jnp.where(not_right, sh, 0.0)
                    acc = acc + jnp.dot(w_ref[t], sh.astype(jnp.bfloat16),
                                        preferred_element_type=jnp.float32)
                    t += 1
            y = acc + b_ref[...]
            return y * jax.nn.sigmoid(y)

        x = x_ref[0]                                        # (cin_p, HW) bf16
        y0 = conv1x1(x, wrefs[0], wrefs[1])                 # (cv1out_p, HW)
        cat_ref[0:cv1out_p, :] = y0

        # The split of y0 is baked into m[0].cv1's weight columns, so the
        # first bottleneck consumes the full padded y0 directly.
        cur = y0
        ch = cv1out_p
        wi = 2
        for i in range(n):
            t1 = conv3x3(cur, wrefs[wi], wrefs[wi + 1]); wi += 2
            cur = conv3x3(t1, wrefs[wi], wrefs[wi + 1]); wi += 2
            cat_ref[ch:ch + seg_p[i], :] = cur
            ch += seg_p[i]

        yout = conv1x1(cat_ref[...], wrefs[wi], wrefs[wi + 1])
        o_ref[0] = yout[0:cv2out, :]

    return kernel


@functools.partial(jax.jit, static_argnames=("cfg",))
def c2f_pruned_forward(x_nchw, weights, cfg: C2fConfig):
    N, Cin, H, W = x_nchw.shape
    HW = H * W
    cin_p = _pad8(Cin)

    x2 = x_nchw.reshape(N, Cin, HW)
    if cin_p != Cin:
        x2 = jnp.pad(x2, ((0, 0), (0, cin_p - Cin), (0, 0)))
    x2 = x2.astype(jnp.bfloat16)

    cv1out_p = _pad8(cfg.cv1out)
    cat_p = cv1out_p + sum(_pad8(c) for c in cfg.inner_cv2outs)
    pad_rows = max([cv1out_p]
                   + [_pad8(c) for c in cfg.inner_cv1outs]
                   + [_pad8(c) for c in cfg.inner_cv2outs])
    pad_w = HW + 2 * W + 2

    kernel = _make_c2f_kernel(cfg, H, W)

    in_specs = [pl.BlockSpec((1, cin_p, HW), lambda b: (b, 0, 0))]
    for warr in weights:
        in_specs.append(
            pl.BlockSpec(warr.shape, (lambda r: (lambda b: (0,) * r))(warr.ndim)))

    out = pl.pallas_call(
        kernel,
        out_shape=jax.ShapeDtypeStruct((N, cfg.cv2out, HW), jnp.float32),
        grid=(N,),
        in_specs=in_specs,
        out_specs=pl.BlockSpec((1, cfg.cv2out, HW), lambda b: (b, 0, 0)),
        scratch_shapes=[pltpu.VMEM((cat_p, HW), jnp.float32),
                        pltpu.VMEM((pad_rows, pad_w), jnp.float32)],
        compiler_params=pltpu.CompilerParams(
            dimension_semantics=("parallel",)),
    )(x2, *weights)
    return out.reshape(N, cfg.cv2out, H, W)


# ----------------------------------------------------------------------------
# Parameter construction and packing
# ----------------------------------------------------------------------------
def make_conv_raw(key, cin, cout, k):
    k1, k2, k3, k4, k5 = jax.random.split(key, 5)
    w = jax.random.normal(k1, (cout, cin, k, k), jnp.float32) * 0.2   # OIHW
    gamma = jax.random.uniform(k2, (cout,), minval=0.5, maxval=1.5)
    beta = jax.random.normal(k3, (cout,)) * 0.1
    mean = jax.random.normal(k4, (cout,)) * 0.1
    var = jax.random.uniform(k5, (cout,), minval=0.5, maxval=1.5)
    eps = 1e-3                                       # ultralytics BN eps
    scale = gamma / jnp.sqrt(var + eps)
    bias = beta - mean * scale
    return {"w": w, "scale": scale, "bias": bias, "k": k,
            "pad": 1 if k == 3 else 0}


def _fold(raw):
    return raw["w"] * raw["scale"][:, None, None, None]


def _pack_1x1(raw, ci_cols, ci_p):
    w = _fold(raw)[:, :, 0, 0]                        # (co, ci)
    co = w.shape[0]
    co_p = _pad8(co)
    wp = jnp.zeros((co_p, ci_p), jnp.float32)
    wp = wp.at[:co, jnp.array(ci_cols)].set(w)
    bp = jnp.zeros((co_p, 1), jnp.float32).at[:co, 0].set(raw["bias"])
    return wp.astype(jnp.bfloat16), bp


def _pack_3x3(raw, ci_off, ci_p):
    w = _fold(raw)                                    # (co, ci, 3, 3)
    co, ci = w.shape[0], w.shape[1]
    co_p = _pad8(co)
    wt = jnp.transpose(w, (2, 3, 0, 1)).reshape(9, co, ci)   # (tap, co, ci)
    wp = jnp.zeros((9, co_p, ci_p), jnp.float32)
    wp = wp.at[:, :co, ci_off:ci_off + ci].set(wt)
    bp = jnp.zeros((co_p, 1), jnp.float32).at[:co, 0].set(raw["bias"])
    return wp.astype(jnp.bfloat16), bp


def make_c2f_pruned(key, cfg: C2fConfig):
    assert sum(cfg.split) == cfg.cv1out
    assert len(cfg.inner_cv1outs) == len(cfg.inner_cv2outs)
    n = len(cfg.inner_cv1outs)
    keys = jax.random.split(key, 2 + 2 * n)

    raw = {"cv1": make_conv_raw(keys[0], cfg.cv1in, cfg.cv1out, 1), "m": []}
    c = cfg.split[1]
    for i in range(n):
        r1 = make_conv_raw(keys[2 + 2 * i], c, cfg.inner_cv1outs[i], 3)
        r2 = make_conv_raw(keys[3 + 2 * i], cfg.inner_cv1outs[i],
                           cfg.inner_cv2outs[i], 3)
        raw["m"].append({"cv1": r1, "cv2": r2})
        c = cfg.inner_cv2outs[i]
    cv2_in = cfg.cv1out + sum(cfg.inner_cv2outs)
    raw["cv2"] = make_conv_raw(keys[1], cv2_in, cfg.cv2out, 1)

    weights = []
    w, b = _pack_1x1(raw["cv1"], list(range(cfg.cv1in)), _pad8(cfg.cv1in))
    weights += [w, b]
    # bottlenecks: the first one reads the y0 split, baked into weight columns
    in_off, in_p = cfg.split[0], _pad8(cfg.cv1out)
    for i in range(n):
        w, b = _pack_3x3(raw["m"][i]["cv1"], in_off, in_p)
        weights += [w, b]
        w, b = _pack_3x3(raw["m"][i]["cv2"], 0, _pad8(cfg.inner_cv1outs[i]))
        weights += [w, b]
        in_off, in_p = 0, _pad8(cfg.inner_cv2outs[i])
    # cv2: scatter real input channels into the padded concat-buffer layout
    col_map, off = [], 0
    for real in (cfg.cv1out,) + tuple(cfg.inner_cv2outs):
        col_map += [off + c for c in range(real)]
        off += _pad8(real)
    w, b = _pack_1x1(raw["cv2"], col_map, off)
    weights += [w, b]
    return tuple(weights), raw


# ----------------------------------------------------------------------------
# Pure-JAX reference (lax.conv).  quant=True mirrors the kernel's bf16
# rounding points (weights + per-conv inputs) with f32 accumulation.
# ----------------------------------------------------------------------------
def _ref_conv(x, p, quant):
    wf = _fold(p)
    if quant:
        wf = wf.astype(jnp.bfloat16).astype(jnp.float32)
        x = x.astype(jnp.bfloat16).astype(jnp.float32)
    pad = p["pad"]
    y = lax.conv_general_dilated(
        x, wf, window_strides=(1, 1), padding=[(pad, pad), (pad, pad)],
        dimension_numbers=("NCHW", "OIHW", "NCHW"),
        precision=lax.Precision.HIGHEST)
    y = y + p["bias"][None, :, None, None]
    return y * jax.nn.sigmoid(y)


def c2f_pruned_reference(x_nchw, raw, cfg: C2fConfig, quant=False):
    y0 = _ref_conv(x_nchw, raw["cv1"], quant)
    s0 = cfg.split[0]
    ys = [y0[:, :s0], y0[:, s0:]]
    cur = ys[-1]
    for bp in raw["m"]:
        cur = _ref_conv(_ref_conv(cur, bp["cv1"], quant), bp["cv2"], quant)
        ys.append(cur)
    return _ref_conv(jnp.concatenate(ys, axis=1), raw["cv2"], quant)


# ----------------------------------------------------------------------------
if __name__ == "__main__":
    key = jax.random.PRNGKey(0)
    k_param, k_x = jax.random.split(key)

    # Pruned head config: cv1 6ch split (2,4); bottlenecks 4->3->5 and 5->5->7
    cfg = C2fConfig(cv1in=4, cv1out=6, split=(2, 4),
                    inner_cv1outs=(3, 5), inner_cv2outs=(5, 7), cv2out=8)

    weights, raw = make_c2f_pruned(k_param, cfg)
    x = jax.random.normal(k_x, (2, cfg.cv1in, 16, 16), jnp.float32)   # NCHW

    out = jax.block_until_ready(c2f_pruned_forward(x, weights, cfg))
    assert out.shape == (2, cfg.cv2out, 16, 16), out.shape

    # Tight check vs a reference with the same bf16 rounding points.
    ref_q = jax.block_until_ready(c2f_pruned_reference(x, raw, cfg, quant=True))
    err_q = float(jnp.max(jnp.abs(out - ref_q)))
    assert err_q < 1e-2, err_q
    # Loose sanity check vs the pure-f32 reference (bf16 MXU rounding budget).
    ref_f = jax.block_until_ready(c2f_pruned_reference(x, raw, cfg, quant=False))
    err_f = float(jnp.max(jnp.abs(out - ref_f)))
    assert err_f < 2.5e-1, err_f

    print("KERNEL_OK")
</pallas_src>

<mosaic_0001>
module attributes {stable_mosaic.version = 11 : i64} {
  func.func @kernel(%arg0: i32, %arg1: memref<1x8x256xbf16, #tpu.memory_space<vmem>>, %arg2: memref<8x8xbf16, #tpu.memory_space<vmem>>, %arg3: memref<8x1xf32, #tpu.memory_space<vmem>>, %arg4: memref<9x8x8xbf16, #tpu.memory_space<vmem>>, %arg5: memref<8x1xf32, #tpu.memory_space<vmem>>, %arg6: memref<9x8x8xbf16, #tpu.memory_space<vmem>>, %arg7: memref<8x1xf32, #tpu.memory_space<vmem>>, %arg8: memref<9x8x8xbf16, #tpu.memory_space<vmem>>, %arg9: memref<8x1xf32, #tpu.memory_space<vmem>>, %arg10: memref<9x8x8xbf16, #tpu.memory_space<vmem>>, %arg11: memref<8x1xf32, #tpu.memory_space<vmem>>, %arg12: memref<8x24xbf16, #tpu.memory_space<vmem>>, %arg13: memref<8x1xf32, #tpu.memory_space<vmem>>, %arg14: memref<1x8x256xf32, #tpu.memory_space<vmem>>, %arg15: memref<24x256xf32, #tpu.memory_space<vmem>>, %arg16: memref<8x290xf32, #tpu.memory_space<vmem>>) attributes {dimension_semantics = [#tpu.dimension_semantics<parallel>], iteration_bounds = array<i64: 2>, scalar_prefetch = 0 : i64, scratch_operands = 2 : i64, tpu.core_type = #tpu.core_type<tc>, window_params = [{transform_indices = @transform_0, window_bounds = array<i64: 1, 8, 256>}, {pipeline_mode = #tpu.pipeline_mode<synchronous>, transform_indices = @transform_1, window_bounds = array<i64: 8, 8>}, {pipeline_mode = #tpu.pipeline_mode<synchronous>, transform_indices = @transform_2, window_bounds = array<i64: 8, 1>}, {pipeline_mode = #tpu.pipeline_mode<synchronous>, transform_indices = @transform_3, window_bounds = array<i64: 9, 8, 8>}, {pipeline_mode = #tpu.pipeline_mode<synchronous>, transform_indices = @transform_4, window_bounds = array<i64: 8, 1>}, {pipeline_mode = #tpu.pipeline_mode<synchronous>, transform_indices = @transform_5, window_bounds = array<i64: 9, 8, 8>}, {pipeline_mode = #tpu.pipeline_mode<synchronous>, transform_indices = @transform_6, window_bounds = array<i64: 8, 1>}, {pipeline_mode = #tpu.pipeline_mode<synchronous>, transform_indices = @transform_7, window_bounds = array<i64: 9, 8, 8>}, {pipeline_mode = #tpu.pipeline_mode<synchronous>, transform_indices = @transform_8, window_bounds = array<i64: 8, 1>}, {pipeline_mode = #tpu.pipeline_mode<synchronous>, transform_indices = @transform_9, window_bounds = array<i64: 9, 8, 8>}, {pipeline_mode = #tpu.pipeline_mode<synchronous>, transform_indices = @transform_10, window_bounds = array<i64: 8, 1>}, {pipeline_mode = #tpu.pipeline_mode<synchronous>, transform_indices = @transform_11, window_bounds = array<i64: 8, 24>}, {pipeline_mode = #tpu.pipeline_mode<synchronous>, transform_indices = @transform_12, window_bounds = array<i64: 8, 1>}, {transform_indices = @transform_13, window_bounds = array<i64: 1, 8, 256>}]} {
    %cst = arith.constant 0.000000e+00 : f32
    %0 = vector.broadcast %cst : f32 to vector<8x290xf32>
    %c0 = arith.constant 0 : index
    %c0_0 = arith.constant 0 : index
    %1 = vector.load %arg16[%c0, %c0_0] : memref<8x290xf32, #tpu.memory_space<vmem>>, vector<8x290xf32>
    tpu.vector_store %arg16[%c0, %c0_0], %0 {strides = array<i32>} : memref<8x290xf32, #tpu.memory_space<vmem>>, vector<8x290xf32>,
    %2 = tpu.iota {dimensions = array<i32: 1>} : vector<1x256xi32>
    %c16_i32 = arith.constant 16 : i32
    %c0_i32 = arith.constant 0 : i32
    %3 = arith.cmpi eq, %c16_i32, %c0_i32 : i32
    %c1_i32 = arith.constant 1 : i32
    %4 = arith.select %3, %c1_i32, %c16_i32 : i32
    %5 = vector.broadcast %4 : i32 to vector<1x256xi32>
    %6 = arith.remsi %2, %5 : vector<1x256xi32>
    %c0_i32_1 = arith.constant 0 : i32
    %7 = vector.broadcast %c0_i32_1 : i32 to vector<1x256xi32>
    %8 = arith.cmpi ne, %6, %7 : vector<1x256xi32>
    %c0_i32_2 = arith.constant 0 : i32
    %9 = vector.broadcast %c0_i32_2 : i32 to vector<1x256xi32>
    %10 = arith.cmpi slt, %6, %9 : vector<1x256xi32>
    %c0_i32_3 = arith.constant 0 : i32
    %11 = arith.cmpi slt, %4, %c0_i32_3 : i32
    %12 = vector.broadcast %11 : i1 to vector<1x256xi1>
    %13 = vector.broadcast %12 : vector<1x256xi1> to vector<1x256xi1>
    %14 = arith.xori %10, %13 : vector<1x256xi1>
    %15 = arith.andi %14, %8 : vector<1x256xi1>
    %16 = vector.broadcast %4 : i32 to vector<1x256xi32>
    %17 = arith.addi %6, %16 : vector<1x256xi32>
    %18 = arith.select %15, %17, %6 : vector<1x256xi1>, vector<1x256xi32>
    %c1_i32_4 = arith.constant 1 : i32
    %19 = vector.broadcast %c1_i32_4 : i32 to vector<1x256xi32>
    %20 = arith.cmpi sge, %18, %19 : vector<1x256xi32>
    %c15_i32 = arith.constant 15 : i32
    %21 = vector.broadcast %c15_i32 : i32 to vector<1x256xi32>
    %22 = arith.cmpi slt, %18, %21 : vector<1x256xi32>
    %c0_5 = arith.constant 0 : index
    %c0_6 = arith.constant 0 : index
    %c0_7 = arith.constant 0 : index
    %23 = vector.load %arg1[%c0_5, %c0_6, %c0_7] : memref<1x8x256xbf16, #tpu.memory_space<vmem>>, vector<1x8x256xbf16>
    %24 = vector.shape_cast %23 : vector<1x8x256xbf16> to vector<8x256xbf16>
    %c0_8 = arith.constant 0 : index
    %c0_9 = arith.constant 0 : index
    %25 = vector.load %arg2[%c0_8, %c0_9] : memref<8x8xbf16, #tpu.memory_space<vmem>>, vector<8x8xbf16>
    %cst_10 = arith.constant dense<0.000000e+00> : vector<8x256xf32>
    %26 = tpu.matmul %25, %24, %cst_10 {dimension_numbers = #tpu.dot_dimension_numbers<[1], [0], [0], [1], [0, 0, 1, 1], [], []>} : vector<8x8xbf16>, vector<8x256xbf16>, vector<8x256xf32> -> vector<8x256xf32>
    %c0_11 = arith.constant 0 : index
    %c0_12 = arith.constant 0 : index
    %27 = vector.load %arg3[%c0_11, %c0_12] : memref<8x1xf32, #tpu.memory_space<vmem>>, vector<8x1xf32>
    %28 = vector.broadcast %27 : vector<8x1xf32> to vector<8x256xf32>
    %29 = arith.addf %26, %28 : vector<8x256xf32>
    %30 = arith.negf %29 : vector<8x256xf32>
    %31 = math.exp %30 : vector<8x256xf32>
    %cst_13 = arith.constant 1.000000e+00 : f32
    %32 = vector.broadcast %cst_13 : f32 to vector<8x256xf32>
    %33 = arith.addf %32, %31 : vector<8x256xf32>
    %34 = arith.divf %32, %33 : vector<8x256xf32>
    %35 = arith.mulf %29, %34 : vector<8x256xf32>
    %c0_14 = arith.constant 0 : index
    %c0_15 = arith.constant 0 : index
    %36 = vector.load %arg15[%c0_14, %c0_15] : memref<24x256xf32, #tpu.memory_space<vmem>>, vector<8x256xf32>
    tpu.vector_store %arg15[%c0_14, %c0_15], %35 {strides = array<i32>} : memref<24x256xf32, #tpu.memory_space<vmem>>, vector<8x256xf32>,
    %c0_16 = arith.constant 0 : index
    %c17 = arith.constant 17 : index
    %37 = vector.load %arg16[%c0_16, %c17] : memref<8x290xf32, #tpu.memory_space<vmem>>, vector<8x256xf32>
    tpu.vector_store %arg16[%c0_16, %c17], %35 {strides = array<i32>} : memref<8x290xf32, #tpu.memory_space<vmem>>, vector<8x256xf32>,
    %cst_17 = arith.constant 0.000000e+00 : f32
    %38 = vector.broadcast %cst_17 : f32 to vector<8x256xf32>
    %c0_18 = arith.constant 0 : index
    %c0_19 = arith.constant 0 : index
    %39 = vector.load %arg16[%c0_18, %c0_19] : memref<8x290xf32, #tpu.memory_space<vmem>>, vector<8x256xf32>
    %cst_20 = arith.constant 0.000000e+00 : f32
    %40 = vector.shape_cast %20 : vector<1x256xi1> to vector<1x256xi1>
    %41 = vector.broadcast %40 : vector<1x256xi1> to vector<8x256xi1>
    %42 = vector.broadcast %cst_20 : f32 to vector<8x256xf32>
    %43 = arith.select %41, %39, %42 : vector<8x256xi1>, vector<8x256xf32>
    %c0_21 = arith.constant 0 : index
    %c0_22 = arith.constant 0 : index
    %c0_23 = arith.constant 0 : index
    %44 = vector.load %arg4[%c0_21, %c0_22, %c0_23] : memref<9x8x8xbf16, #tpu.memory_space<vmem>>, vector<1x8x8xbf16>
    %45 = vector.shape_cast %44 : vector<1x8x8xbf16> to vector<8x8xbf16>
    %46 = arith.truncf %43 : vector<8x256xf32> to vector<8x256xbf16>
    %cst_24 = arith.constant dense<0.000000e+00> : vector<8x256xf32>
    %47 = tpu.matmul %45, %46, %cst_24 {dimension_numbers = #tpu.dot_dimension_numbers<[1], [0], [0], [1], [0, 0, 1, 1], [], []>} : vector<8x8xbf16>, vector<8x256xbf16>, vector<8x256xf32> -> vector<8x256xf32>
    %48 = arith.addf %38, %47 : vector<8x256xf32>
    %c0_25 = arith.constant 0 : index
    %c1 = arith.constant 1 : index
    %49 = vector.load %arg16[%c0_25, %c1] : memref<8x290xf32, #tpu.memory_space<vmem>>, vector<8x256xf32>
    %c1_26 = arith.constant 1 : index
    %c0_27 = arith.constant 0 : index
    %c0_28 = arith.constant 0 : index
    %50 = vector.load %arg4[%c1_26, %c0_27, %c0_28] : memref<9x8x8xbf16, #tpu.memory_space<vmem>>, vector<1x8x8xbf16>
    %51 = vector.shape_cast %50 : vector<1x8x8xbf16> to vector<8x8xbf16>
    %52 = arith.truncf %49 : vector<8x256xf32> to vector<8x256xbf16>
    %cst_29 = arith.constant dense<0.000000e+00> : vector<8x256xf32>
    %53 = tpu.matmul %51, %52, %cst_29 {dimension_numbers = #tpu.dot_dimension_numbers<[1], [0], [0], [1], [0, 0, 1, 1], [], []>} : vector<8x8xbf16>, vector<8x256xbf16>, vector<8x256xf32> -> vector<8x256xf32>
    %54 = arith.addf %48, %53 : vector<8x256xf32>
    %c0_30 = arith.constant 0 : index
    %c2 = arith.constant 2 : index
    %55 = vector.load %arg16[%c0_30, %c2] : memref<8x290xf32, #tpu.memory_space<vmem>>, vector<8x256xf32>
    %cst_31 = arith.constant 0.000000e+00 : f32
    %56 = vector.shape_cast %22 : vector<1x256xi1> to vector<1x256xi1>
    %57 = vector.broadcast %56 : vector<1x256xi1> to vector<8x256xi1>
    %58 = vector.broadcast %cst_31 : f32 to vector<8x256xf32>
    %59 = arith.select %57, %55, %58 : vector<8x256xi1>, vector<8x256xf32>
    %c2_32 = arith.constant 2 : index
    %c0_33 = arith.constant 0 : index
    %c0_34 = arith.constant 0 : index
    %60 = vector.load %arg4[%c2_32, %c0_33, %c0_34] : memref<9x8x8xbf16, #tpu.memory_space<vmem>>, vector<1x8x8xbf16>
    %61 = vector.shape_cast %60 : vector<1x8x8xbf16> to vector<8x8xbf16>
    %62 = arith.truncf %59 : vector<8x256xf32> to vector<8x256xbf16>
    %cst_35 = arith.constant dense<0.000000e+00> : vector<8x256xf32>
    %63 = tpu.matmul %61, %62, %cst_35 {dimension_numbers = #tpu.dot_dimension_numbers<[1], [0], [0], [1], [0, 0, 1, 1], [], []>} : vector<8x8xbf16>, vector<8x256xbf16>, vector<8x256xf32> -> vector<8x256xf32>
    %64 = arith.addf %54, %63 : vector<8x256xf32>
    %c0_36 = arith.constant 0 : index
    %c16 = arith.constant 16 : index
    %65 = vector.load %arg16[%c0_36, %c16] : memref<8x290xf32, #tpu.memory_space<vmem>>, vector<8x256xf32>
    %cst_37 = arith.constant 0.000000e+00 : f32
    %66 = vector.shape_cast %20 : vector<1x256xi1> to vector<1x256xi1>
    %67 = vector.broadcast %66 : vector<1x256xi1> to vector<8x256xi1>
    %68 = vector.broadcast %cst_37 : f32 to vector<8x256xf32>
    %69 = arith.select %67, %65, %68 : vector<8x256xi1>, vector<8x256xf32>
    %c3 = arith.constant 3 : index
    %c0_38 = arith.constant 0 : index
    %c0_39 = arith.constant 0 : index
    %70 = vector.load %arg4[%c3, %c0_38, %c0_39] : memref<9x8x8xbf16, #tpu.memory_space<vmem>>, vector<1x8x8xbf16>
    %71 = vector.shape_cast %70 : vector<1x8x8xbf16> to vector<8x8xbf16>
    %72 = arith.truncf %69 : vector<8x256xf32> to vector<8x256xbf16>
    %cst_40 = arith.constant dense<0.000000e+00> : vector<8x256xf32>
    %73 = tpu.matmul %71, %72, %cst_40 {dimension_numbers = #tpu.dot_dimension_numbers<[1], [0], [0], [1], [0, 0, 1, 1], [], []>} : vector<8x8xbf16>, vector<8x256xbf16>, vector<8x256xf32> -> vector<8x256xf32>
    %74 = arith.addf %64, %73 : vector<8x256xf32>
    %c0_41 = arith.constant 0 : index
    %c17_42 = arith.constant 17 : index
    %75 = vector.load %arg16[%c0_41, %c17_42] : memref<8x290xf32, #tpu.memory_space<vmem>>, vector<8x256xf32>
    %c4 = arith.constant 4 : index
    %c0_43 = arith.constant 0 : index
    %c0_44 = arith.constant 0 : index
    %76 = vector.load %arg4[%c4, %c0_43, %c0_44] : memref<9x8x8xbf16, #tpu.memory_space<vmem>>, vector<1x8x8xbf16>
    %77 = vector.shape_cast %76 : vector<1x8x8xbf16> to vector<8x8xbf16>
    %78 = arith.truncf %75 : vector<8x256xf32> to vector<8x256xbf16>
    %cst_45 = arith.constant dense<0.000000e+00> : vector<8x256xf32>
    %79 = tpu.matmul %77, %78, %cst_45 {dimension_numbers = #tpu.dot_dimension_numbers<[1], [0], [0], [1], [0, 0, 1, 1], [], []>} : vector<8x8xbf16>, vector<8x256xbf16>, vector<8x256xf32> -> vector<8x256xf32>
    %80 = arith.addf %74, %79 : vector<8x256xf32>
    %c0_46 = arith.constant 0 : index
    %c18 = arith.constant 18 : index
    %81 = vector.load %arg16[%c0_46, %c18] : memref<8x290xf32, #tpu.memory_space<vmem>>, vector<8x256xf32>
    %cst_47 = arith.constant 0.000000e+00 : f32
    %82 = vector.shape_cast %22 : vector<1x256xi1> to vector<1x256xi1>
    %83 = vector.broadcast %82 : vector<1x256xi1> to vector<8x256xi1>
    %84 = vector.broadcast %cst_47 : f32 to vector<8x256xf32>
    %85 = arith.select %83, %81, %84 : vector<8x256xi1>, vector<8x256xf32>
    %c5 = arith.constant 5 : index
    %c0_48 = arith.constant 0 : index
    %c0_49 = arith.constant 0 : index
    %86 = vector.load %arg4[%c5, %c0_48, %c0_49] : memref<9x8x8xbf16, #tpu.memory_space<vmem>>, vector<1x8x8xbf16>
    %87 = vector.shape_cast %86 : vector<1x8x8xbf16> to vector<8x8xbf16>
    %88 = arith.truncf %85 : vector<8x256xf32> to vector<8x256xbf16>
    %cst_50 = arith.constant dense<0.000000e+00> : vector<8x256xf32>
    %89 = tpu.matmul %87, %88, %cst_50 {dimension_numbers = #tpu.dot_dimension_numbers<[1], [0], [0], [1], [0, 0, 1, 1], [], []>} : vector<8x8xbf16>, vector<8x256xbf16>, vector<8x256xf32> -> vector<8x256xf32>
    %90 = arith.addf %80, %89 : vector<8x256xf32>
    %c0_51 = arith.constant 0 : index
    %c32 = arith.constant 32 : index
    %91 = vector.load %arg16[%c0_51, %c32] : memref<8x290xf32, #tpu.memory_space<vmem>>, vector<8x256xf32>
    %cst_52 = arith.constant 0.000000e+00 : f32
    %92 = vector.shape_cast %20 : vector<1x256xi1> to vector<1x256xi1>
    %93 = vector.broadcast %92 : vector<1x256xi1> to vector<8x256xi1>
    %94 = vector.broadcast %cst_52 : f32 to vector<8x256xf32>
    %95 = arith.select %93, %91, %94 : vector<8x256xi1>, vector<8x256xf32>
    %c6 = arith.constant 6 : index
    %c0_53 = arith.constant 0 : index
    %c0_54 = arith.constant 0 : index
    %96 = vector.load %arg4[%c6, %c0_53, %c0_54] : memref<9x8x8xbf16, #tpu.memory_space<vmem>>, vector<1x8x8xbf16>
    %97 = vector.shape_cast %96 : vector<1x8x8xbf16> to vector<8x8xbf16>
    %98 = arith.truncf %95 : vector<8x256xf32> to vector<8x256xbf16>
    %cst_55 = arith.constant dense<0.000000e+00> : vector<8x256xf32>
    %99 = tpu.matmul %97, %98, %cst_55 {dimension_numbers = #tpu.dot_dimension_numbers<[1], [0], [0], [1], [0, 0, 1, 1], [], []>} : vector<8x8xbf16>, vector<8x256xbf16>, vector<8x256xf32> -> vector<8x256xf32>
    %100 = arith.addf %90, %99 : vector<8x256xf32>
    %c0_56 = arith.constant 0 : index
    %c33 = arith.constant 33 : index
    %101 = vector.load %arg16[%c0_56, %c33] : memref<8x290xf32, #tpu.memory_space<vmem>>, vector<8x256xf32>
    %c7 = arith.constant 7 : index
    %c0_57 = arith.constant 0 : index
    %c0_58 = arith.constant 0 : index
    %102 = vector.load %arg4[%c7, %c0_57, %c0_58] : memref<9x8x8xbf16, #tpu.memory_space<vmem>>, vector<1x8x8xbf16>
    %103 = vector.shape_cast %102 : vector<1x8x8xbf16> to vector<8x8xbf16>
    %104 = arith.truncf %101 : vector<8x256xf32> to vector<8x256xbf16>
    %cst_59 = arith.constant dense<0.000000e+00> : vector<8x256xf32>
    %105 = tpu.matmul %103, %104, %cst_59 {dimension_numbers = #tpu.dot_dimension_numbers<[1], [0], [0], [1], [0, 0, 1, 1], [], []>} : vector<8x8xbf16>, vector<8x256xbf16>, vector<8x256xf32> -> vector<8x256xf32>
    %106 = arith.addf %100, %105 : vector<8x256xf32>
    %c0_60 = arith.constant 0 : index
    %c34 = arith.constant 34 : index
    %107 = vector.load %arg16[%c0_60, %c34] : memref<8x290xf32, #tpu.memory_space<vmem>>, vector<8x256xf32>
    %cst_61 = arith.constant 0.000000e+00 : f32
    %108 = vector.shape_cast %22 : vector<1x256xi1> to vector<1x256xi1>
    %109 = vector.broadcast %108 : vector<1x256xi1> to vector<8x256xi1>
    %110 = vector.broadcast %cst_61 : f32 to vector<8x256xf32>
    %111 = arith.select %109, %107, %110 : vector<8x256xi1>, vector<8x256xf32>
    %c8 = arith.constant 8 : index
    %c0_62 = arith.constant 0 : index
    %c0_63 = arith.constant 0 : index
    %112 = vector.load %arg4[%c8, %c0_62, %c0_63] : memref<9x8x8xbf16, #tpu.memory_space<vmem>>, vector<1x8x8xbf16>
    %113 = vector.shape_cast %112 : vector<1x8x8xbf16> to vector<8x8xbf16>
    %114 = arith.truncf %111 : vector<8x256xf32> to vector<8x256xbf16>
    %cst_64 = arith.constant dense<0.000000e+00> : vector<8x256xf32>
    %115 = tpu.matmul %113, %114, %cst_64 {dimension_numbers = #tpu.dot_dimension_numbers<[1], [0], [0], [1], [0, 0, 1, 1], [], []>} : vector<8x8xbf16>, vector<8x256xbf16>, vector<8x256xf32> -> vector<8x256xf32>
    %116 = arith.addf %106, %115 : vector<8x256xf32>
    %c0_65 = arith.constant 0 : index
    %c0_66 = arith.constant 0 : index
    %117 = vector.load %arg5[%c0_65, %c0_66] : memref<8x1xf32, #tpu.memory_space<vmem>>, vector<8x1xf32>
    %118 = vector.broadcast %117 : vector<8x1xf32> to vector<8x256xf32>
    %119 = arith.addf %116, %118 : vector<8x256xf32>
    %120 = arith.negf %119 : vector<8x256xf32>
    %121 = math.exp %120 : vector<8x256xf32>
    %cst_67 = arith.constant 1.000000e+00 : f32
    %122 = vector.broadcast %cst_67 : f32 to vector<8x256xf32>
    %123 = arith.addf %122, %121 : vector<8x256xf32>
    %124 = arith.divf %122, %123 : vector<8x256xf32>
    %125 = arith.mulf %119, %124 : vector<8x256xf32>
    %c0_68 = arith.constant 0 : index
    %c17_69 = arith.constant 17 : index
    %126 = vector.load %arg16[%c0_68, %c17_69] : memref<8x290xf32, #tpu.memory_space<vmem>>, vector<8x256xf32>
    tpu.vector_store %arg16[%c0_68, %c17_69], %125 {strides = array<i32>} : memref<8x290xf32, #tpu.memory_space<vmem>>, vector<8x256xf32>,
    %cst_70 = arith.constant 0.000000e+00 : f32
    %127 = vector.broadcast %cst_70 : f32 to vector<8x256xf32>
    %c0_71 = arith.constant 0 : index
    %c0_72 = arith.constant 0 : index
    %128 = vector.load %arg16[%c0_71, %c0_72] : memref<8x290xf32, #tpu.memory_space<vmem>>, vector<8x256xf32>
    %cst_73 = arith.constant 0.000000e+00 : f32
    %129 = vector.shape_cast %20 : vector<1x256xi1> to vector<1x256xi1>
    %130 = vector.broadcast %129 : vector<1x256xi1> to vector<8x256xi1>
    %131 = vector.broadcast %cst_73 : f32 to vector<8x256xf32>
    %132 = arith.select %130, %128, %131 : vector<8x256xi1>, vector<8x256xf32>
    %c0_74 = arith.constant 0 : index
    %c0_75 = arith.constant 0 : index
    %c0_76 = arith.constant 0 : index
    %133 = vector.load %arg6[%c0_74, %c0_75, %c0_76] : memref<9x8x8xbf16, #tpu.memory_space<vmem>>, vector<1x8x8xbf16>
    %134 = vector.shape_cast %133 : vector<1x8x8xbf16> to vector<8x8xbf16>
    %135 = arith.truncf %132 : vector<8x256xf32> to vector<8x256xbf16>
    %cst_77 = arith.constant dense<0.000000e+00> : vector<8x256xf32>
    %136 = tpu.matmul %134, %135, %cst_77 {dimension_numbers = #tpu.dot_dimension_numbers<[1], [0], [0], [1], [0, 0, 1, 1], [], []>} : vector<8x8xbf16>, vector<8x256xbf16>, vector<8x256xf32> -> vector<8x256xf32>
    %137 = arith.addf %127, %136 : vector<8x256xf32>
    %c0_78 = arith.constant 0 : index
    %c1_79 = arith.constant 1 : index
    %138 = vector.load %arg16[%c0_78, %c1_79] : memref<8x290xf32, #tpu.memory_space<vmem>>, vector<8x256xf32>
    %c1_80 = arith.constant 1 : index
    %c0_81 = arith.constant 0 : index
    %c0_82 = arith.constant 0 : index
    %139 = vector.load %arg6[%c1_80, %c0_81, %c0_82] : memref<9x8x8xbf16, #tpu.memory_space<vmem>>, vector<1x8x8xbf16>
    %140 = vector.shape_cast %139 : vector<1x8x8xbf16> to vector<8x8xbf16>
    %141 = arith.truncf %138 : vector<8x256xf32> to vector<8x256xbf16>
    %cst_83 = arith.constant dense<0.000000e+00> : vector<8x256xf32>
    %142 = tpu.matmul %140, %141, %cst_83 {dimension_numbers = #tpu.dot_dimension_numbers<[1], [0], [0], [1], [0, 0, 1, 1], [], []>} : vector<8x8xbf16>, vector<8x256xbf16>, vector<8x256xf32> -> vector<8x256xf32>
    %143 = arith.addf %137, %142 : vector<8x256xf32>
    %c0_84 = arith.constant 0 : index
    %c2_85 = arith.constant 2 : index
    %144 = vector.load %arg16[%c0_84, %c2_85] : memref<8x290xf32, #tpu.memory_space<vmem>>, vector<8x256xf32>
    %cst_86 = arith.constant 0.000000e+00 : f32
    %145 = vector.shape_cast %22 : vector<1x256xi1> to vector<1x256xi1>
    %146 = vector.broadcast %145 : vector<1x256xi1> to vector<8x256xi1>
    %147 = vector.broadcast %cst_86 : f32 to vector<8x256xf32>
    %148 = arith.select %146, %144, %147 : vector<8x256xi1>, vector<8x256xf32>
    %c2_87 = arith.constant 2 : index
    %c0_88 = arith.constant 0 : index
    %c0_89 = arith.constant 0 : index
    %149 = vector.load %arg6[%c2_87, %c0_88, %c0_89] : memref<9x8x8xbf16, #tpu.memory_space<vmem>>, vector<1x8x8xbf16>
    %150 = vector.shape_cast %149 : vector<1x8x8xbf16> to vector<8x8xbf16>
    %151 = arith.truncf %148 : vector<8x256xf32> to vector<8x256xbf16>
    %cst_90 = arith.constant dense<0.000000e+00> : vector<8x256xf32>
    %152 = tpu.matmul %150, %151, %cst_90 {dimension_numbers = #tpu.dot_dimension_numbers<[1], [0], [0], [1], [0, 0, 1, 1], [], []>} : vector<8x8xbf16>, vector<8x256xbf16>, vector<8x256xf32> -> vector<8x256xf32>
    %153 = arith.addf %143, %152 : vector<8x256xf32>
    %c0_91 = arith.constant 0 : index
    %c16_92 = arith.constant 16 : index
    %154 = vector.load %arg16[%c0_91, %c16_92] : memref<8x290xf32, #tpu.memory_space<vmem>>, vector<8x256xf32>
    %cst_93 = arith.constant 0.000000e+00 : f32
    %155 = vector.shape_cast %20 : vector<1x256xi1> to vector<1x256xi1>
    %156 = vector.broadcast %155 : vector<1x256xi1> to vector<8x256xi1>
    %157 = vector.broadcast %cst_93 : f32 to vector<8x256xf32>
    %158 = arith.select %156, %154, %157 : vector<8x256xi1>, vector<8x256xf32>
    %c3_94 = arith.constant 3 : index
    %c0_95 = arith.constant 0 : index
    %c0_96 = arith.constant 0 : index
    %159 = vector.load %arg6[%c3_94, %c0_95, %c0_96] : memref<9x8x8xbf16, #tpu.memory_space<vmem>>, vector<1x8x8xbf16>
    %160 = vector.shape_cast %159 : vector<1x8x8xbf16> to vector<8x8xbf16>
    %161 = arith.truncf %158 : vector<8x256xf32> to vector<8x256xbf16>
    %cst_97 = arith.constant dense<0.000000e+00> : vector<8x256xf32>
    %162 = tpu.matmul %160, %161, %cst_97 {dimension_numbers = #tpu.dot_dimension_numbers<[1], [0], [0], [1], [0, 0, 1, 1], [], []>} : vector<8x8xbf16>, vector<8x256xbf16>, vector<8x256xf32> -> vector<8x256xf32>
    %163 = arith.addf %153, %162 : vector<8x256xf32>
    %c0_98 = arith.constant 0 : index
    %c17_99 = arith.constant 17 : index
    %164 = vector.load %arg16[%c0_98, %c17_99] : memref<8x290xf32, #tpu.memory_space<vmem>>, vector<8x256xf32>
    %c4_100 = arith.constant 4 : index
    %c0_101 = arith.constant 0 : index
    %c0_102 = arith.constant 0 : index
    %165 = vector.load %arg6[%c4_100, %c0_101, %c0_102] : memref<9x8x8xbf16, #tpu.memory_space<vmem>>, vector<1x8x8xbf16>
    %166 = vector.shape_cast %165 : vector<1x8x8xbf16> to vector<8x8xbf16>
    %167 = arith.truncf %164 : vector<8x256xf32> to vector<8x256xbf16>
    %cst_103 = arith.constant dense<0.000000e+00> : vector<8x256xf32>
    %168 = tpu.matmul %166, %167, %cst_103 {dimension_numbers = #tpu.dot_dimension_numbers<[1], [0], [0], [1], [0, 0, 1, 1], [], []>} : vector<8x8xbf16>, vector<8x256xbf16>, vector<8x256xf32> -> vector<8x256xf32>
    %169 = arith.addf %163, %168 : vector<8x256xf32>
    %c0_104 = arith.constant 0 : index
    %c18_105 = arith.constant 18 : index
    %170 = vector.load %arg16[%c0_104, %c18_105] : memref<8x290xf32, #tpu.memory_space<vmem>>, vector<8x256xf32>
    %cst_106 = arith.constant 0.000000e+00 : f32
    %171 = vector.shape_cast %22 : vector<1x256xi1> to vector<1x256xi1>
    %172 = vector.broadcast %171 : vector<1x256xi1> to vector<8x256xi1>
    %173 = vector.broadcast %cst_106 : f32 to vector<8x256xf32>
    %174 = arith.select %172, %170, %173 : vector<8x256xi1>, vector<8x256xf32>
    %c5_107 = arith.constant 5 : index
    %c0_108 = arith.constant 0 : index
    %c0_109 = arith.constant 0 : index
    %175 = vector.load %arg6[%c5_107, %c0_108, %c0_109] : memref<9x8x8xbf16, #tpu.memory_space<vmem>>, vector<1x8x8xbf16>
    %176 = vector.shape_cast %175 : vector<1x8x8xbf16> to vector<8x8xbf16>
    %177 = arith.truncf %174 : vector<8x256xf32> to vector<8x256xbf16>
    %cst_110 = arith.constant dense<0.000000e+00> : vector<8x256xf32>
    %178 = tpu.matmul %176, %177, %cst_110 {dimension_numbers = #tpu.dot_dimension_numbers<[1], [0], [0], [1], [0, 0, 1, 1], [], []>} : vector<8x8xbf16>, vector<8x256xbf16>, vector<8x256xf32> -> vector<8x256xf32>
    %179 = arith.addf %169, %178 : vector<8x256xf32>
    %c0_111 = arith.constant 0 : index
    %c32_112 = arith.constant 32 : index
    %180 = vector.load %arg16[%c0_111, %c32_112] : memref<8x290xf32, #tpu.memory_space<vmem>>, vector<8x256xf32>
    %cst_113 = arith.constant 0.000000e+00 : f32
    %181 = vector.shape_cast %20 : vector<1x256xi1> to vector<1x256xi1>
    %182 = vector.broadcast %181 : vector<1x256xi1> to vector<8x256xi1>
    %183 = vector.broadcast %cst_113 : f32 to vector<8x256xf32>
    %184 = arith.select %182, %180, %183 : vector<8x256xi1>, vector<8x256xf32>
    %c6_114 = arith.constant 6 : index
    %c0_115 = arith.constant 0 : index
    %c0_116 = arith.constant 0 : index
    %185 = vector.load %arg6[%c6_114, %c0_115, %c0_116] : memref<9x8x8xbf16, #tpu.memory_space<vmem>>, vector<1x8x8xbf16>
    %186 = vector.shape_cast %185 : vector<1x8x8xbf16> to vector<8x8xbf16>
    %187 = arith.truncf %184 : vector<8x256xf32> to vector<8x256xbf16>
    %cst_117 = arith.constant dense<0.000000e+00> : vector<8x256xf32>
    %188 = tpu.matmul %186, %187, %cst_117 {dimension_numbers = #tpu.dot_dimension_numbers<[1], [0], [0], [1], [0, 0, 1, 1], [], []>} : vector<8x8xbf16>, vector<8x256xbf16>, vector<8x256xf32> -> vector<8x256xf32>
    %189 = arith.addf %179, %188 : vector<8x256xf32>
    %c0_118 = arith.constant 0 : index
    %c33_119 = arith.constant 33 : index
    %190 = vector.load %arg16[%c0_118, %c33_119] : memref<8x290xf32, #tpu.memory_space<vmem>>, vector<8x256xf32>
    %c7_120 = arith.constant 7 : index
    %c0_121 = arith.constant 0 : index
    %c0_122 = arith.constant 0 : index
    %191 = vector.load %arg6[%c7_120, %c0_121, %c0_122] : memref<9x8x8xbf16, #tpu.memory_space<vmem>>, vector<1x8x8xbf16>
    %192 = vector.shape_cast %191 : vector<1x8x8xbf16> to vector<8x8xbf16>
    %193 = arith.truncf %190 : vector<8x256xf32> to vector<8x256xbf16>
    %cst_123 = arith.constant dense<0.000000e+00> : vector<8x256xf32>
    %194 = tpu.matmul %192, %193, %cst_123 {dimension_numbers = #tpu.dot_dimension_numbers<[1], [0], [0], [1], [0, 0, 1, 1], [], []>} : vector<8x8xbf16>, vector<8x256xbf16>, vector<8x256xf32> -> vector<8x256xf32>
    %195 = arith.addf %189, %194 : vector<8x256xf32>
    %c0_124 = arith.constant 0 : index
    %c34_125 = arith.constant 34 : index
    %196 = vector.load %arg16[%c0_124, %c34_125] : memref<8x290xf32, #tpu.memory_space<vmem>>, vector<8x256xf32>
    %cst_126 = arith.constant 0.000000e+00 : f32
    %197 = vector.shape_cast %22 : vector<1x256xi1> to vector<1x256xi1>
    %198 = vector.broadcast %197 : vector<1x256xi1> to vector<8x256xi1>
    %199 = vector.broadcast %cst_126 : f32 to vector<8x256xf32>
    %200 = arith.select %198, %196, %199 : vector<8x256xi1>, vector<8x256xf32>
    %c8_127 = arith.constant 8 : index
    %c0_128 = arith.constant 0 : index
    %c0_129 = arith.constant 0 : index
    %201 = vector.load %arg6[%c8_127, %c0_128, %c0_129] : memref<9x8x8xbf16, #tpu.memory_space<vmem>>, vector<1x8x8xbf16>
    %202 = vector.shape_cast %201 : vector<1x8x8xbf16> to vector<8x8xbf16>
    %203 = arith.truncf %200 : vector<8x256xf32> to vector<8x256xbf16>
    %cst_130 = arith.constant dense<0.000000e+00> : vector<8x256xf32>
    %204 = tpu.matmul %202, %203, %cst_130 {dimension_numbers = #tpu.dot_dimension_numbers<[1], [0], [0], [1], [0, 0, 1, 1], [], []>} : vector<8x8xbf16>, vector<8x256xbf16>, vector<8x256xf32> -> vector<8x256xf32>
    %205 = arith.addf %195, %204 : vector<8x256xf32>
    %c0_131 = arith.constant 0 : index
    %c0_132 = arith.constant 0 : index
    %206 = vector.load %arg7[%c0_131, %c0_132] : memref<8x1xf32, #tpu.memory_space<vmem>>, vector<8x1xf32>
    %207 = vector.broadcast %206 : vector<8x1xf32> to vector<8x256xf32>
    %208 = arith.addf %205, %207 : vector<8x256xf32>
    %209 = arith.negf %208 : vector<8x256xf32>
    %210 = math.exp %209 : vector<8x256xf32>
    %cst_133 = arith.constant 1.000000e+00 : f32
    %211 = vector.broadcast %cst_133 : f32 to vector<8x256xf32>
    %212 = arith.addf %211, %210 : vector<8x256xf32>
    %213 = arith.divf %211, %212 : vector<8x256xf32>
    %214 = arith.mulf %208, %213 : vector<8x256xf32>
    %c8_134 = arith.constant 8 : index
    %c0_135 = arith.constant 0 : index
    %215 = vector.load %arg15[%c8_134, %c0_135] : memref<24x256xf32, #tpu.memory_space<vmem>>, vector<8x256xf32>
    tpu.vector_store %arg15[%c8_134, %c0_135], %214 {strides = array<i32>} : memref<24x256xf32, #tpu.memory_space<vmem>>, vector<8x256xf32>,
    %c0_136 = arith.constant 0 : index
    %c17_137 = arith.constant 17 : index
    %216 = vector.load %arg16[%c0_136, %c17_137] : memref<8x290xf32, #tpu.memory_space<vmem>>, vector<8x256xf32>
    tpu.vector_store %arg16[%c0_136, %c17_137], %214 {strides = array<i32>} : memref<8x290xf32, #tpu.memory_space<vmem>>, vector<8x256xf32>,
    %cst_138 = arith.constant 0.000000e+00 : f32
    %217 = vector.broadcast %cst_138 : f32 to vector<8x256xf32>
    %c0_139 = arith.constant 0 : index
    %c0_140 = arith.constant 0 : index
    %218 = vector.load %arg16[%c0_139, %c0_140] : memref<8x290xf32, #tpu.memory_space<vmem>>, vector<8x256xf32>
    %cst_141 = arith.constant 0.000000e+00 : f32
    %219 = vector.shape_cast %20 : vector<1x256xi1> to vector<1x256xi1>
    %220 = vector.broadcast %219 : vector<1x256xi1> to vector<8x256xi1>
    %221 = vector.broadcast %cst_141 : f32 to vector<8x256xf32>
    %222 = arith.select %220, %218, %221 : vector<8x256xi1>, vector<8x256xf32>
    %c0_142 = arith.constant 0 : index
    %c0_143 = arith.constant 0 : index
    %c0_144 = arith.constant 0 : index
    %223 = vector.load %arg8[%c0_142, %c0_143, %c0_144] : memref<9x8x8xbf16, #tpu.memory_space<vmem>>, vector<1x8x8xbf16>
    %224 = vector.shape_cast %223 : vector<1x8x8xbf16> to vector<8x8xbf16>
    %225 = arith.truncf %222 : vector<8x256xf32> to vector<8x256xbf16>
    %cst_145 = arith.constant dense<0.000000e+00> : vector<8x256xf32>
    %226 = tpu.matmul %224, %225, %cst_145 {dimension_numbers = #tpu.dot_dimension_numbers<[1], [0], [0], [1], [0, 0, 1, 1], [], []>} : vector<8x8xbf16>, vector<8x256xbf16>, vector<8x256xf32> -> vector<8x256xf32>
    %227 = arith.addf %217, %226 : vector<8x256xf32>
    %c0_146 = arith.constant 0 : index
    %c1_147 = arith.constant 1 : index
    %228 = vector.load %arg16[%c0_146, %c1_147] : memref<8x290xf32, #tpu.memory_space<vmem>>, vector<8x256xf32>
    %c1_148 = arith.constant 1 : index
    %c0_149 = arith.constant 0 : index
    %c0_150 = arith.constant 0 : index
    %229 = vector.load %arg8[%c1_148, %c0_149, %c0_150] : memref<9x8x8xbf16, #tpu.memory_space<vmem>>, vector<1x8x8xbf16>
    %230 = vector.shape_cast %229 : vector<1x8x8xbf16> to vector<8x8xbf16>
    %231 = arith.truncf %228 : vector<8x256xf32> to vector<8x256xbf16>
    %cst_151 = arith.constant dense<0.000000e+00> : vector<8x256xf32>
    %232 = tpu.matmul %230, %231, %cst_151 {dimension_numbers = #tpu.dot_dimension_numbers<[1], [0], [0], [1], [0, 0, 1, 1], [], []>} : vector<8x8xbf16>, vector<8x256xbf16>, vector<8x256xf32> -> vector<8x256xf32>
    %233 = arith.addf %227, %232 : vector<8x256xf32>
    %c0_152 = arith.constant 0 : index
    %c2_153 = arith.constant 2 : index
    %234 = vector.load %arg16[%c0_152, %c2_153] : memref<8x290xf32, #tpu.memory_space<vmem>>, vector<8x256xf32>
    %cst_154 = arith.constant 0.000000e+00 : f32
    %235 = vector.shape_cast %22 : vector<1x256xi1> to vector<1x256xi1>
    %236 = vector.broadcast %235 : vector<1x256xi1> to vector<8x256xi1>
    %237 = vector.broadcast %cst_154 : f32 to vector<8x256xf32>
    %238 = arith.select %236, %234, %237 : vector<8x256xi1>, vector<8x256xf32>
    %c2_155 = arith.constant 2 : index
    %c0_156 = arith.constant 0 : index
    %c0_157 = arith.constant 0 : index
    %239 = vector.load %arg8[%c2_155, %c0_156, %c0_157] : memref<9x8x8xbf16, #tpu.memory_space<vmem>>, vector<1x8x8xbf16>
    %240 = vector.shape_cast %239 : vector<1x8x8xbf16> to vector<8x8xbf16>
    %241 = arith.truncf %238 : vector<8x256xf32> to vector<8x256xbf16>
    %cst_158 = arith.constant dense<0.000000e+00> : vector<8x256xf32>
    %242 = tpu.matmul %240, %241, %cst_158 {dimension_numbers = #tpu.dot_dimension_numbers<[1], [0], [0], [1], [0, 0, 1, 1], [], []>} : vector<8x8xbf16>, vector<8x256xbf16>, vector<8x256xf32> -> vector<8x256xf32>
    %243 = arith.addf %233, %242 : vector<8x256xf32>
    %c0_159 = arith.constant 0 : index
    %c16_160 = arith.constant 16 : index
    %244 = vector.load %arg16[%c0_159, %c16_160] : memref<8x290xf32, #tpu.memory_space<vmem>>, vector<8x256xf32>
    %cst_161 = arith.constant 0.000000e+00 : f32
    %245 = vector.shape_cast %20 : vector<1x256xi1> to vector<1x256xi1>
    %246 = vector.broadcast %245 : vector<1x256xi1> to vector<8x256xi1>
    %247 = vector.broadcast %cst_161 : f32 to vector<8x256xf32>
    %248 = arith.select %246, %244, %247 : vector<8x256xi1>, vector<8x256xf32>
    %c3_162 = arith.constant 3 : index
    %c0_163 = arith.constant 0 : index
    %c0_164 = arith.constant 0 : index
    %249 = vector.load %arg8[%c3_162, %c0_163, %c0_164] : memref<9x8x8xbf16, #tpu.memory_space<vmem>>, vector<1x8x8xbf16>
    %250 = vector.shape_cast %249 : vector<1x8x8xbf16> to vector<8x8xbf16>
    %251 = arith.truncf %248 : vector<8x256xf32> to vector<8x256xbf16>
    %cst_165 = arith.constant dense<0.000000e+00> : vector<8x256xf32>
    %252 = tpu.matmul %250, %251, %cst_165 {dimension_numbers = #tpu.dot_dimension_numbers<[1], [0], [0], [1], [0, 0, 1, 1], [], []>} : vector<8x8xbf16>, vector<8x256xbf16>, vector<8x256xf32> -> vector<8x256xf32>
    %253 = arith.addf %243, %252 : vector<8x256xf32>
    %c0_166 = arith.constant 0 : index
    %c17_167 = arith.constant 17 : index
    %254 = vector.load %arg16[%c0_166, %c17_167] : memref<8x290xf32, #tpu.memory_space<vmem>>, vector<8x256xf32>
    %c4_168 = arith.constant 4 : index
    %c0_169 = arith.constant 0 : index
    %c0_170 = arith.constant 0 : index
    %255 = vector.load %arg8[%c4_168, %c0_169, %c0_170] : memref<9x8x8xbf16, #tpu.memory_space<vmem>>, vector<1x8x8xbf16>
    %256 = vector.shape_cast %255 : vector<1x8x8xbf16> to vector<8x8xbf16>
    %257 = arith.truncf %254 : vector<8x256xf32> to vector<8x256xbf16>
    %cst_171 = arith.constant dense<0.000000e+00> : vector<8x256xf32>
    %258 = tpu.matmul %256, %257, %cst_171 {dimension_numbers = #tpu.dot_dimension_numbers<[1], [0], [0], [1], [0, 0, 1, 1], [], []>} : vector<8x8xbf16>, vector<8x256xbf16>, vector<8x256xf32> -> vector<8x256xf32>
    %259 = arith.addf %253, %258 : vector<8x256xf32>
    %c0_172 = arith.constant 0 : index
    %c18_173 = arith.constant 18 : index
    %260 = vector.load %arg16[%c0_172, %c18_173] : memref<8x290xf32, #tpu.memory_space<vmem>>, vector<8x256xf32>
    %cst_174 = arith.constant 0.000000e+00 : f32
    %261 = vector.shape_cast %22 : vector<1x256xi1> to vector<1x256xi1>
    %262 = vector.broadcast %261 : vector<1x256xi1> to vector<8x256xi1>
    %263 = vector.broadcast %cst_174 : f32 to vector<8x256xf32>
    %264 = arith.select %262, %260, %263 : vector<8x256xi1>, vector<8x256xf32>
    %c5_175 = arith.constant 5 : index
    %c0_176 = arith.constant 0 : index
    %c0_177 = arith.constant 0 : index
    %265 = vector.load %arg8[%c5_175, %c0_176, %c0_177] : memref<9x8x8xbf16, #tpu.memory_space<vmem>>, vector<1x8x8xbf16>
    %266 = vector.shape_cast %265 : vector<1x8x8xbf16> to vector<8x8xbf16>
    %267 = arith.truncf %264 : vector<8x256xf32> to vector<8x256xbf16>
    %cst_178 = arith.constant dense<0.000000e+00> : vector<8x256xf32>
    %268 = tpu.matmul %266, %267, %cst_178 {dimension_numbers = #tpu.dot_dimension_numbers<[1], [0], [0], [1], [0, 0, 1, 1], [], []>} : vector<8x8xbf16>, vector<8x256xbf16>, vector<8x256xf32> -> vector<8x256xf32>
    %269 = arith.addf %259, %268 : vector<8x256xf32>
    %c0_179 = arith.constant 0 : index
    %c32_180 = arith.constant 32 : index
    %270 = vector.load %arg16[%c0_179, %c32_180] : memref<8x290xf32, #tpu.memory_space<vmem>>, vector<8x256xf32>
    %cst_181 = arith.constant 0.000000e+00 : f32
    %271 = vector.shape_cast %20 : vector<1x256xi1> to vector<1x256xi1>
    %272 = vector.broadcast %271 : vector<1x256xi1> to vector<8x256xi1>
    %273 = vector.broadcast %cst_181 : f32 to vector<8x256xf32>
    %274 = arith.select %272, %270, %273 : vector<8x256xi1>, vector<8x256xf32>
    %c6_182 = arith.constant 6 : index
    %c0_183 = arith.constant 0 : index
    %c0_184 = arith.constant 0 : index
    %275 = vector.load %arg8[%c6_182, %c0_183, %c0_184] : memref<9x8x8xbf16, #tpu.memory_space<vmem>>, vector<1x8x8xbf16>
    %276 = vector.shape_cast %275 : vector<1x8x8xbf16> to vector<8x8xbf16>
    %277 = arith.truncf %274 : vector<8x256xf32> to vector<8x256xbf16>
    %cst_185 = arith.constant dense<0.000000e+00> : vector<8x256xf32>
    %278 = tpu.matmul %276, %277, %cst_185 {dimension_numbers = #tpu.dot_dimension_numbers<[1], [0], [0], [1], [0, 0, 1, 1], [], []>} : vector<8x8xbf16>, vector<8x256xbf16>, vector<8x256xf32> -> vector<8x256xf32>
    %279 = arith.addf %269, %278 : vector<8x256xf32>
    %c0_186 = arith.constant 0 : index
    %c33_187 = arith.constant 33 : index
    %280 = vector.load %arg16[%c0_186, %c33_187] : memref<8x290xf32, #tpu.memory_space<vmem>>, vector<8x256xf32>
    %c7_188 = arith.constant 7 : index
    %c0_189 = arith.constant 0 : index
    %c0_190 = arith.constant 0 : index
    %281 = vector.load %arg8[%c7_188, %c0_189, %c0_190] : memref<9x8x8xbf16, #tpu.memory_space<vmem>>, vector<1x8x8xbf16>
    %282 = vector.shape_cast %281 : vector<1x8x8xbf16> to vector<8x8xbf16>
    %283 = arith.truncf %280 : vector<8x256xf32> to vector<8x256xbf16>
    %cst_191 = arith.constant dense<0.000000e+00> : vector<8x256xf32>
    %284 = tpu.matmul %282, %283, %cst_191 {dimension_numbers = #tpu.dot_dimension_numbers<[1], [0], [0], [1], [0, 0, 1, 1], [], []>} : vector<8x8xbf16>, vector<8x256xbf16>, vector<8x256xf32> -> vector<8x256xf32>
    %285 = arith.addf %279, %284 : vector<8x256xf32>
    %c0_192 = arith.constant 0 : index
    %c34_193 = arith.constant 34 : index
    %286 = vector.load %arg16[%c0_192, %c34_193] : memref<8x290xf32, #tpu.memory_space<vmem>>, vector<8x256xf32>
    %cst_194 = arith.constant 0.000000e+00 : f32
    %287 = vector.shape_cast %22 : vector<1x256xi1> to vector<1x256xi1>
    %288 = vector.broadcast %287 : vector<1x256xi1> to vector<8x256xi1>
    %289 = vector.broadcast %cst_194 : f32 to vector<8x256xf32>
    %290 = arith.select %288, %286, %289 : vector<8x256xi1>, vector<8x256xf32>
    %c8_195 = arith.constant 8 : index
    %c0_196 = arith.constant 0 : index
    %c0_197 = arith.constant 0 : index
    %291 = vector.load %arg8[%c8_195, %c0_196, %c0_197] : memref<9x8x8xbf16, #tpu.memory_space<vmem>>, vector<1x8x8xbf16>
    %292 = vector.shape_cast %291 : vector<1x8x8xbf16> to vector<8x8xbf16>
    %293 = arith.truncf %290 : vector<8x256xf32> to vector<8x256xbf16>
    %cst_198 = arith.constant dense<0.000000e+00> : vector<8x256xf32>
    %294 = tpu.matmul %292, %293, %cst_198 {dimension_numbers = #tpu.dot_dimension_numbers<[1], [0], [0], [1], [0, 0, 1, 1], [], []>} : vector<8x8xbf16>, vector<8x256xbf16>, vector<8x256xf32> -> vector<8x256xf32>
    %295 = arith.addf %285, %294 : vector<8x256xf32>
    %c0_199 = arith.constant 0 : index
    %c0_200 = arith.constant 0 : index
    %296 = vector.load %arg9[%c0_199, %c0_200] : memref<8x1xf32, #tpu.memory_space<vmem>>, vector<8x1xf32>
    %297 = vector.broadcast %296 : vector<8x1xf32> to vector<8x256xf32>
    %298 = arith.addf %295, %297 : vector<8x256xf32>
    %299 = arith.negf %298 : vector<8x256xf32>
    %300 = math.exp %299 : vector<8x256xf32>
    %cst_201 = arith.constant 1.000000e+00 : f32
    %301 = vector.broadcast %cst_201 : f32 to vector<8x256xf32>
    %302 = arith.addf %301, %300 : vector<8x256xf32>
    %303 = arith.divf %301, %302 : vector<8x256xf32>
    %304 = arith.mulf %298, %303 : vector<8x256xf32>
    %c0_202 = arith.constant 0 : index
    %c17_203 = arith.constant 17 : index
    %305 = vector.load %arg16[%c0_202, %c17_203] : memref<8x290xf32, #tpu.memory_space<vmem>>, vector<8x256xf32>
    tpu.vector_store %arg16[%c0_202, %c17_203], %304 {strides = array<i32>} : memref<8x290xf32, #tpu.memory_space<vmem>>, vector<8x256xf32>,
    %cst_204 = arith.constant 0.000000e+00 : f32
    %306 = vector.broadcast %cst_204 : f32 to vector<8x256xf32>
    %c0_205 = arith.constant 0 : index
    %c0_206 = arith.constant 0 : index
    %307 = vector.load %arg16[%c0_205, %c0_206] : memref<8x290xf32, #tpu.memory_space<vmem>>, vector<8x256xf32>
    %cst_207 = arith.constant 0.000000e+00 : f32
    %308 = vector.shape_cast %20 : vector<1x256xi1> to vector<1x256xi1>
    %309 = vector.broadcast %308 : vector<1x256xi1> to vector<8x256xi1>
    %310 = vector.broadcast %cst_207 : f32 to vector<8x256xf32>
    %311 = arith.select %309, %307, %310 : vector<8x256xi1>, vector<8x256xf32>
    %c0_208 = arith.constant 0 : index
    %c0_209 = arith.constant 0 : index
    %c0_210 = arith.constant 0 : index
    %312 = vector.load %arg10[%c0_208, %c0_209, %c0_210] : memref<9x8x8xbf16, #tpu.memory_space<vmem>>, vector<1x8x8xbf16>
    %313 = vector.shape_cast %312 : vector<1x8x8xbf16> to vector<8x8xbf16>
    %314 = arith.truncf %311 : vector<8x256xf32> to vector<8x256xbf16>
    %cst_211 = arith.constant dense<0.000000e+00> : vector<8x256xf32>
    %315 = tpu.matmul %313, %314, %cst_211 {dimension_numbers = #tpu.dot_dimension_numbers<[1], [0], [0], [1], [0, 0, 1, 1], [], []>} : vector<8x8xbf16>, vector<8x256xbf16>, vector<8x256xf32> -> vector<8x256xf32>
    %316 = arith.addf %306, %315 : vector<8x256xf32>
    %c0_212 = arith.constant 0 : index
    %c1_213 = arith.constant 1 : index
    %317 = vector.load %arg16[%c0_212, %c1_213] : memref<8x290xf32, #tpu.memory_space<vmem>>, vector<8x256xf32>
    %c1_214 = arith.constant 1 : index
    %c0_215 = arith.constant 0 : index
    %c0_216 = arith.constant 0 : index
    %318 = vector.load %arg10[%c1_214, %c0_215, %c0_216] : memref<9x8x8xbf16, #tpu.memory_space<vmem>>, vector<1x8x8xbf16>
    %319 = vector.shape_cast %318 : vector<1x8x8xbf16> to vector<8x8xbf16>
    %320 = arith.truncf %317 : vector<8x256xf32> to vector<8x256xbf16>
    %cst_217 = arith.constant dense<0.000000e+00> : vector<8x256xf32>
    %321 = tpu.matmul %319, %320, %cst_217 {dimension_numbers = #tpu.dot_dimension_numbers<[1], [0], [0], [1], [0, 0, 1, 1], [], []>} : vector<8x8xbf16>, vector<8x256xbf16>, vector<8x256xf32> -> vector<8x256xf32>
    %322 = arith.addf %316, %321 : vector<8x256xf32>
    %c0_218 = arith.constant 0 : index
    %c2_219 = arith.constant 2 : index
    %323 = vector.load %arg16[%c0_218, %c2_219] : memref<8x290xf32, #tpu.memory_space<vmem>>, vector<8x256xf32>
    %cst_220 = arith.constant 0.000000e+00 : f32
    %324 = vector.shape_cast %22 : vector<1x256xi1> to vector<1x256xi1>
    %325 = vector.broadcast %324 : vector<1x256xi1> to vector<8x256xi1>
    %326 = vector.broadcast %cst_220 : f32 to vector<8x256xf32>
    %327 = arith.select %325, %323, %326 : vector<8x256xi1>, vector<8x256xf32>
    %c2_221 = arith.constant 2 : index
    %c0_222 = arith.constant 0 : index
    %c0_223 = arith.constant 0 : index
    %328 = vector.load %arg10[%c2_221, %c0_222, %c0_223] : memref<9x8x8xbf16, #tpu.memory_space<vmem>>, vector<1x8x8xbf16>
    %329 = vector.shape_cast %328 : vector<1x8x8xbf16> to vector<8x8xbf16>
    %330 = arith.truncf %327 : vector<8x256xf32> to vector<8x256xbf16>
    %cst_224 = arith.constant dense<0.000000e+00> : vector<8x256xf32>
    %331 = tpu.matmul %329, %330, %cst_224 {dimension_numbers = #tpu.dot_dimension_numbers<[1], [0], [0], [1], [0, 0, 1, 1], [], []>} : vector<8x8xbf16>, vector<8x256xbf16>, vector<8x256xf32> -> vector<8x256xf32>
    %332 = arith.addf %322, %331 : vector<8x256xf32>
    %c0_225 = arith.constant 0 : index
    %c16_226 = arith.constant 16 : index
    %333 = vector.load %arg16[%c0_225, %c16_226] : memref<8x290xf32, #tpu.memory_space<vmem>>, vector<8x256xf32>
    %cst_227 = arith.constant 0.000000e+00 : f32
    %334 = vector.shape_cast %20 : vector<1x256xi1> to vector<1x256xi1>
    %335 = vector.broadcast %334 : vector<1x256xi1> to vector<8x256xi1>
    %336 = vector.broadcast %cst_227 : f32 to vector<8x256xf32>
    %337 = arith.select %335, %333, %336 : vector<8x256xi1>, vector<8x256xf32>
    %c3_228 = arith.constant 3 : index
    %c0_229 = arith.constant 0 : index
    %c0_230 = arith.constant 0 : index
    %338 = vector.load %arg10[%c3_228, %c0_229, %c0_230] : memref<9x8x8xbf16, #tpu.memory_space<vmem>>, vector<1x8x8xbf16>
    %339 = vector.shape_cast %338 : vector<1x8x8xbf16> to vector<8x8xbf16>
    %340 = arith.truncf %337 : vector<8x256xf32> to vector<8x256xbf16>
    %cst_231 = arith.constant dense<0.000000e+00> : vector<8x256xf32>
    %341 = tpu.matmul %339, %340, %cst_231 {dimension_numbers = #tpu.dot_dimension_numbers<[1], [0], [0], [1], [0, 0, 1, 1], [], []>} : vector<8x8xbf16>, vector<8x256xbf16>, vector<8x256xf32> -> vector<8x256xf32>
    %342 = arith.addf %332, %341 : vector<8x256xf32>
    %c0_232 = arith.constant 0 : index
    %c17_233 = arith.constant 17 : index
    %343 = vector.load %arg16[%c0_232, %c17_233] : memref<8x290xf32, #tpu.memory_space<vmem>>, vector<8x256xf32>
    %c4_234 = arith.constant 4 : index
    %c0_235 = arith.constant 0 : index
    %c0_236 = arith.constant 0 : index
    %344 = vector.load %arg10[%c4_234, %c0_235, %c0_236] : memref<9x8x8xbf16, #tpu.memory_space<vmem>>, vector<1x8x8xbf16>
    %345 = vector.shape_cast %344 : vector<1x8x8xbf16> to vector<8x8xbf16>
    %346 = arith.truncf %343 : vector<8x256xf32> to vector<8x256xbf16>
    %cst_237 = arith.constant dense<0.000000e+00> : vector<8x256xf32>
    %347 = tpu.matmul %345, %346, %cst_237 {dimension_numbers = #tpu.dot_dimension_numbers<[1], [0], [0], [1], [0, 0, 1, 1], [], []>} : vector<8x8xbf16>, vector<8x256xbf16>, vector<8x256xf32> -> vector<8x256xf32>
    %348 = arith.addf %342, %347 : vector<8x256xf32>
    %c0_238 = arith.constant 0 : index
    %c18_239 = arith.constant 18 : index
    %349 = vector.load %arg16[%c0_238, %c18_239] : memref<8x290xf32, #tpu.memory_space<vmem>>, vector<8x256xf32>
    %cst_240 = arith.constant 0.000000e+00 : f32
    %350 = vector.shape_cast %22 : vector<1x256xi1> to vector<1x256xi1>
    %351 = vector.broadcast %350 : vector<1x256xi1> to vector<8x256xi1>
    %352 = vector.broadcast %cst_240 : f32 to vector<8x256xf32>
    %353 = arith.select %351, %349, %352 : vector<8x256xi1>, vector<8x256xf32>
    %c5_241 = arith.constant 5 : index
    %c0_242 = arith.constant 0 : index
    %c0_243 = arith.constant 0 : index
    %354 = vector.load %arg10[%c5_241, %c0_242, %c0_243] : memref<9x8x8xbf16, #tpu.memory_space<vmem>>, vector<1x8x8xbf16>
    %355 = vector.shape_cast %354 : vector<1x8x8xbf16> to vector<8x8xbf16>
    %356 = arith.truncf %353 : vector<8x256xf32> to vector<8x256xbf16>
    %cst_244 = arith.constant dense<0.000000e+00> : vector<8x256xf32>
    %357 = tpu.matmul %355, %356, %cst_244 {dimension_numbers = #tpu.dot_dimension_numbers<[1], [0], [0], [1], [0, 0, 1, 1], [], []>} : vector<8x8xbf16>, vector<8x256xbf16>, vector<8x256xf32> -> vector<8x256xf32>
    %358 = arith.addf %348, %357 : vector<8x256xf32>
    %c0_245 = arith.constant 0 : index
    %c32_246 = arith.constant 32 : index
    %359 = vector.load %arg16[%c0_245, %c32_246] : memref<8x290xf32, #tpu.memory_space<vmem>>, vector<8x256xf32>
    %cst_247 = arith.constant 0.000000e+00 : f32
    %360 = vector.shape_cast %20 : vector<1x256xi1> to vector<1x256xi1>
    %361 = vector.broadcast %360 : vector<1x256xi1> to vector<8x256xi1>
    %362 = vector.broadcast %cst_247 : f32 to vector<8x256xf32>
    %363 = arith.select %361, %359, %362 : vector<8x256xi1>, vector<8x256xf32>
    %c6_248 = arith.constant 6 : index
    %c0_249 = arith.constant 0 : index
    %c0_250 = arith.constant 0 : index
    %364 = vector.load %arg10[%c6_248, %c0_249, %c0_250] : memref<9x8x8xbf16, #tpu.memory_space<vmem>>, vector<1x8x8xbf16>
    %365 = vector.shape_cast %364 : vector<1x8x8xbf16> to vector<8x8xbf16>
    %366 = arith.truncf %363 : vector<8x256xf32> to vector<8x256xbf16>
    %cst_251 = arith.constant dense<0.000000e+00> : vector<8x256xf32>
    %367 = tpu.matmul %365, %366, %cst_251 {dimension_numbers = #tpu.dot_dimension_numbers<[1], [0], [0], [1], [0, 0, 1, 1], [], []>} : vector<8x8xbf16>, vector<8x256xbf16>, vector<8x256xf32> -> vector<8x256xf32>
    %368 = arith.addf %358, %367 : vector<8x256xf32>
    %c0_252 = arith.constant 0 : index
    %c33_253 = arith.constant 33 : index
    %369 = vector.load %arg16[%c0_252, %c33_253] : memref<8x290xf32, #tpu.memory_space<vmem>>, vector<8x256xf32>
    %c7_254 = arith.constant 7 : index
    %c0_255 = arith.constant 0 : index
    %c0_256 = arith.constant 0 : index
    %370 = vector.load %arg10[%c7_254, %c0_255, %c0_256] : memref<9x8x8xbf16, #tpu.memory_space<vmem>>, vector<1x8x8xbf16>
    %371 = vector.shape_cast %370 : vector<1x8x8xbf16> to vector<8x8xbf16>
    %372 = arith.truncf %369 : vector<8x256xf32> to vector<8x256xbf16>
    %cst_257 = arith.constant dense<0.000000e+00> : vector<8x256xf32>
    %373 = tpu.matmul %371, %372, %cst_257 {dimension_numbers = #tpu.dot_dimension_numbers<[1], [0], [0], [1], [0, 0, 1, 1], [], []>} : vector<8x8xbf16>, vector<8x256xbf16>, vector<8x256xf32> -> vector<8x256xf32>
    %374 = arith.addf %368, %373 : vector<8x256xf32>
    %c0_258 = arith.constant 0 : index
    %c34_259 = arith.constant 34 : index
    %375 = vector.load %arg16[%c0_258, %c34_259] : memref<8x290xf32, #tpu.memory_space<vmem>>, vector<8x256xf32>
    %cst_260 = arith.constant 0.000000e+00 : f32
    %376 = vector.shape_cast %22 : vector<1x256xi1> to vector<1x256xi1>
    %377 = vector.broadcast %376 : vector<1x256xi1> to vector<8x256xi1>
    %378 = vector.broadcast %cst_260 : f32 to vector<8x256xf32>
    %379 = arith.select %377, %375, %378 : vector<8x256xi1>, vector<8x256xf32>
    %c8_261 = arith.constant 8 : index
    %c0_262 = arith.constant 0 : index
    %c0_263 = arith.constant 0 : index
    %380 = vector.load %arg10[%c8_261, %c0_262, %c0_263] : memref<9x8x8xbf16, #tpu.memory_space<vmem>>, vector<1x8x8xbf16>
    %381 = vector.shape_cast %380 : vector<1x8x8xbf16> to vector<8x8xbf16>
    %382 = arith.truncf %379 : vector<8x256xf32> to vector<8x256xbf16>
    %cst_264 = arith.constant dense<0.000000e+00> : vector<8x256xf32>
    %383 = tpu.matmul %381, %382, %cst_264 {dimension_numbers = #tpu.dot_dimension_numbers<[1], [0], [0], [1], [0, 0, 1, 1], [], []>} : vector<8x8xbf16>, vector<8x256xbf16>, vector<8x256xf32> -> vector<8x256xf32>
    %384 = arith.addf %374, %383 : vector<8x256xf32>
    %c0_265 = arith.constant 0 : index
    %c0_266 = arith.constant 0 : index
    %385 = vector.load %arg11[%c0_265, %c0_266] : memref<8x1xf32, #tpu.memory_space<vmem>>, vector<8x1xf32>
    %386 = vector.broadcast %385 : vector<8x1xf32> to vector<8x256xf32>
    %387 = arith.addf %384, %386 : vector<8x256xf32>
    %388 = arith.negf %387 : vector<8x256xf32>
    %389 = math.exp %388 : vector<8x256xf32>
    %cst_267 = arith.constant 1.000000e+00 : f32
    %390 = vector.broadcast %cst_267 : f32 to vector<8x256xf32>
    %391 = arith.addf %390, %389 : vector<8x256xf32>
    %392 = arith.divf %390, %391 : vector<8x256xf32>
    %393 = arith.mulf %387, %392 : vector<8x256xf32>
    %c16_268 = arith.constant 16 : index
    %c0_269 = arith.constant 0 : index
    %394 = vector.load %arg15[%c16_268, %c0_269] : memref<24x256xf32, #tpu.memory_space<vmem>>, vector<8x256xf32>
    tpu.vector_store %arg15[%c16_268, %c0_269], %393 {strides = array<i32>} : memref<24x256xf32, #tpu.memory_space<vmem>>, vector<8x256xf32>,
    %c0_270 = arith.constant 0 : index
    %c0_271 = arith.constant 0 : index
    %395 = vector.load %arg15[%c0_270, %c0_271] : memref<24x256xf32, #tpu.memory_space<vmem>>, vector<24x256xf32>
    %c0_272 = arith.constant 0 : index
    %c0_273 = arith.constant 0 : index
    %396 = vector.load %arg12[%c0_272, %c0_273] : memref<8x24xbf16, #tpu.memory_space<vmem>>, vector<8x24xbf16>
    %397 = arith.truncf %395 : vector<24x256xf32> to vector<24x256xbf16>
    %cst_274 = arith.constant dense<0.000000e+00> : vector<8x256xf32>
    %398 = tpu.matmul %396, %397, %cst_274 {dimension_numbers = #tpu.dot_dimension_numbers<[1], [0], [0], [1], [0, 0, 1, 1], [], []>} : vector<8x24xbf16>, vector<24x256xbf16>, vector<8x256xf32> -> vector<8x256xf32>
    %c0_275 = arith.constant 0 : index
    %c0_276 = arith.constant 0 : index
    %399 = vector.load %arg13[%c0_275, %c0_276] : memref<8x1xf32, #tpu.memory_space<vmem>>, vector<8x1xf32>
    %400 = vector.broadcast %399 : vector<8x1xf32> to vector<8x256xf32>
    %401 = arith.addf %398, %400 : vector<8x256xf32>
    %402 = arith.negf %401 : vector<8x256xf32>
    %403 = math.exp %402 : vector<8x256xf32>
    %cst_277 = arith.constant 1.000000e+00 : f32
    %404 = vector.broadcast %cst_277 : f32 to vector<8x256xf32>
    %405 = arith.addf %404, %403 : vector<8x256xf32>
    %406 = arith.divf %404, %405 : vector<8x256xf32>
    %407 = arith.mulf %401, %406 : vector<8x256xf32>
    %c0_278 = arith.constant 0 : index
    %c0_279 = arith.constant 0 : index
    %c0_280 = arith.constant 0 : index
    %408 = vector.load %arg14[%c0_278, %c0_279, %c0_280] : memref<1x8x256xf32, #tpu.memory_space<vmem>>, vector<1x8x256xf32>
    %409 = vector.shape_cast %408 : vector<1x8x256xf32> to vector<8x256xf32>
    %410 = vector.shape_cast %407 : vector<8x256xf32> to vector<1x8x256xf32>
    tpu.vector_store %arg14[%c0_278, %c0_279, %c0_280], %410 {strides = array<i32>} : memref<1x8x256xf32, #tpu.memory_space<vmem>>, vector<1x8x256xf32>,
    return
  }
  func.func @transform_0(%arg0: i32) -> (i32, i32, i32) {
    %c0_i32 = arith.constant 0 : i32
    %c0_i32_0 = arith.constant 0 : i32
    %c0_i32_1 = arith.constant 0 : i32
    return %arg0, %c0_i32, %c0_i32_0 : i32, i32, i32
  }
  func.func @transform_1(%arg0: i32) -> (i32, i32) {
    %c0_i32 = arith.constant 0 : i32
    %c0_i32_0 = arith.constant 0 : i32
    %c0_i32_1 = arith.constant 0 : i32
    return %c0_i32, %c0_i32_0 : i32, i32
  }
  func.func @transform_2(%arg0: i32) -> (i32, i32) {
    %c0_i32 = arith.constant 0 : i32
    %c0_i32_0 = arith.constant 0 : i32
    %c0_i32_1 = arith.constant 0 : i32
    return %c0_i32, %c0_i32_0 : i32, i32
  }
  func.func @transform_3(%arg0: i32) -> (i32, i32, i32) {
    %c0_i32 = arith.constant 0 : i32
    %c0_i32_0 = arith.constant 0 : i32
    %c0_i32_1 = arith.constant 0 : i32
    %c0_i32_2 = arith.constant 0 : i32
    return %c0_i32, %c0_i32_0, %c0_i32_1 : i32, i32, i32
  }
  func.func @transform_4(%arg0: i32) -> (i32, i32) {
    %c0_i32 = arith.constant 0 : i32
    %c0_i32_0 = arith.constant 0 : i32
    %c0_i32_1 = arith.constant 0 : i32
    return %c0_i32, %c0_i32_0 : i32, i32
  }
  func.func @transform_5(%arg0: i32) -> (i32, i32, i32) {
    %c0_i32 = arith.constant 0 : i32
    %c0_i32_0 = arith.constant 0 : i32
    %c0_i32_1 = arith.constant 0 : i32
    %c0_i32_2 = arith.constant 0 : i32
    return %c0_i32, %c0_i32_0, %c0_i32_1 : i32, i32, i32
  }
  func.func @transform_6(%arg0: i32) -> (i32, i32) {
    %c0_i32 = arith.constant 0 : i32
    %c0_i32_0 = arith.constant 0 : i32
    %c0_i32_1 = arith.constant 0 : i32
    return %c0_i32, %c0_i32_0 : i32, i32
  }
  func.func @transform_7(%arg0: i32) -> (i32, i32, i32) {
    %c0_i32 = arith.constant 0 : i32
    %c0_i32_0 = arith.constant 0 : i32
    %c0_i32_1 = arith.constant 0 : i32
    %c0_i32_2 = arith.constant 0 : i32
    return %c0_i32, %c0_i32_0, %c0_i32_1 : i32, i32, i32
  }
  func.func @transform_8(%arg0: i32) -> (i32, i32) {
    %c0_i32 = arith.constant 0 : i32
    %c0_i32_0 = arith.constant 0 : i32
    %c0_i32_1 = arith.constant 0 : i32
    return %c0_i32, %c0_i32_0 : i32, i32
  }
  func.func @transform_9(%arg0: i32) -> (i32, i32, i32) {
    %c0_i32 = arith.constant 0 : i32
    %c0_i32_0 = arith.constant 0 : i32
    %c0_i32_1 = arith.constant 0 : i32
    %c0_i32_2 = arith.constant 0 : i32
    return %c0_i32, %c0_i32_0, %c0_i32_1 : i32, i32, i32
  }
  func.func @transform_10(%arg0: i32) -> (i32, i32) {
    %c0_i32 = arith.constant 0 : i32
    %c0_i32_0 = arith.constant 0 : i32
    %c0_i32_1 = arith.constant 0 : i32
    return %c0_i32, %c0_i32_0 : i32, i32
  }
  func.func @transform_11(%arg0: i32) -> (i32, i32) {
    %c0_i32 = arith.constant 0 : i32
    %c0_i32_0 = arith.constant 0 : i32
    %c0_i32_1 = arith.constant 0 : i32
    return %c0_i32, %c0_i32_0 : i32, i32
  }
  func.func @transform_12(%arg0: i32) -> (i32, i32) {
    %c0_i32 = arith.constant 0 : i32
    %c0_i32_0 = arith.constant 0 : i32
    %c0_i32_1 = arith.constant 0 : i32
    return %c0_i32, %c0_i32_0 : i32, i32
  }
  func.func @transform_13(%arg0: i32) -> (i32, i32, i32) {
    %c0_i32 = arith.constant 0 : i32
    %c0_i32_0 = arith.constant 0 : i32
    %c0_i32_1 = arith.constant 0 : i32
    return %arg0, %c0_i32, %c0_i32_0 : i32, i32, i32
  }
}

</mosaic_0001>

<bundles_post_ra>
// kernel: c2f_pruned_forward.1
= control target key start
LH: loop header
LB: loop body
LE: loop exit
PB: predicated region body
PF: predicated region fallthrough
CT: control target
= control target key end

     0   :  { %s3618_s25 = smov 0   ;;  %s4223_s0 = inlined_call_operand.vmem [shape: bf16[2,8,256], index: 0, kind: input, shape index: {}]   ;;  %s4224_s1 = inlined_call_operand.vmem [shape: bf16[8,8], index: 1, kind: input, shape index: {}]   ;;  %s4225_s2 = inlined_call_operand.vmem [shape: f32[8,1], index: 2, kind: input, shape index: {}]   ;;  %s4226_s3 = inlined_call_operand.vmem [shape: bf16[9,8,8], index: 3, kind: input, shape index: {}]   ;;  %s4227_s4 = inlined_call_operand.vmem [shape: f32[8,1], index: 4, kind: input, shape index: {}]   ;;  %s4228_s5 = inlined_call_operand.vmem [shape: bf16[9,8,8], index: 5, kind: input, shape index: {}]   ;;  %s4229_s6 = inlined_call_operand.vmem [shape: f32[8,1], index: 6, kind: input, shape index: {}]   ;;  %s4230_s7 = inlined_call_operand.vmem [shape: bf16[9,8,8], index: 7, kind: input, shape index: {}]   ;;  %s4231_s8 = inlined_call_operand.vmem [shape: f32[8,1], index: 8, kind: input, shape index: {}]   ;;  %s4232_s9 = inlined_call_operand.vmem [shape: bf16[9,8,8], index: 9, kind: input, shape index: {}]   ;;  %s4233_s10 = inlined_call_operand.vmem [shape: f32[8,1], index: 10, kind: input, shape index: {}]   ;;  %s4234_s11 = inlined_call_operand.vmem [shape: bf16[8,24], index: 11, kind: input, shape index: {}]   ;;  %s4235_s12 = inlined_call_operand.vmem [shape: f32[8,1], index: 12, kind: input, shape index: {}]   ;;  %s4236_s13 = inlined_call_operand.vmem [shape: f32[2,8,256], index: 13, kind: output, shape index: {}]  }
   0x1 LB: > { %s3223_s26 = sadd.s32 4294967295, %s3535_s25   ;;  %p3227_p0 = scmp.ge.s32.totalorder %s3535_s25, 1  ;;  %s3535_s25 = sphi %s3618_s25, %s23_s25  }
   0x2   : > { %p387_p1 = scmp.lt.s32.totalorder %s3535_s25, 3 }
   0x4   : > { %p388_p2 = pnand %p3227_p0, %p387_p1 }
   0x5   : > { %p431_p3 = scmp.lt.s32.totalorder (!%p388_p2), %s3223_s26, 1  ;;  %v3537_v0 = vmov (!%p388_p2), 0   ;;  %v479_v1 = vld [vmem:[%s4225_s2] sm:$0xff] (!%p388_p2)  ;;  %vm494_vm0 = vcmask (!%p388_p2), 1043456   ;;  %vm490_vm1 = vcmask (!%p388_p2), 64512   ;;  %v3538_v7 = vmov (!%p388_p2), 0.0  }
   0x6   : > { %391 = sbr.rel (%p388_p2) target bundleno = 2624 (0xa40), region = 72  ;;  %533 = vmatprep.mubr.bf16.mxu0 (!%p388_p2), %v3537_v0  ;;  %3377 = vset.pattern.permute.xlu0 (!%p388_p2), %v3537_v0  ;;  %v478_v6 = vld [vmem:[%s4224_s1] sm:$0xf] (!%p388_p2)  ;;  %442 = vst [vmem:[#allocation3] sm:$0xff] (!%p388_p2), %v3538_v7  ;;  %vm444_vm2 = vcmask (!%p388_p2), 277504   ;;  %s3539_s18 = smov (!%p388_p2), 17   ;;  %v446_v25 = vlaneseq (!%p388_p2) }
   0x7   : > { %482 = vperm.xlu0 (!%p388_p2), %3377, %v479_v1   ;;  %643 = vmatprep.mubr.bf16.mxu1 (!%p388_p2), %v3537_v0  ;;  %445 = vst.msk [vmem:[#allocation3 + $0x10] sm:$0xff] (!%p388_p2), %vm444_vm2, %v3538_v7  ;;  %vm569_vm3 = vcmask (!%p388_p2), 1047688   ;;  %vm564_vm4 = vcmask (!%p388_p2), 138240   ;;  %s3540_s19 = smov (!%p388_p2), 127   ;;  %s3541_s20 = smov (!%p388_p2), 126   ;;  %v1180_v47 = vld [vmem:[%s4227_s4] sm:$0xff] (!%p388_p2) }
   0x8   : > { %3478 = vset.pattern.permute.xlu1 (!%p388_p2), %v3537_v0  ;;  %v3654_v26 = vand.u32 (!%p388_p2), 127, %v446_v25  ;;  %v581_v46 = vld [vmem:[%s4226_s3] sm:$0xf] (!%p388_p2)  ;;  %s3542_s23 = smov (!%p388_p2), 112   ;;  %s3543_s24 = smov (!%p388_p2), 111   ;;  %vm599_vm7 = vcmask (!%p388_p2), 1039360  }
   0x9   : > { %s3544_s27 = smov (!%p388_p2), 110   ;;  %s3545_s28 = smov (!%p388_p2), 96   ;;  %vm715_vm8 = vcmask (!%p388_p2), 1031168   ;;  %vm784_vm10 = vcmask (!%p388_p2), 916480   ;;  %v3238_v1 = vld [vmem:[%s4226_s3 + $0x4] sm:$0xf] (!%p388_p2) }
   0xa   : > { %v3657_v27 = vadd.s32 (!%p388_p2), 128, %v3654_v26  ;;  %v453_v33 = vand.u32 (!%p388_p2), 15, %v3654_v26  ;;  %s3547_s30 = smov (!%p388_p2), 95   ;;  %vm916_vm12 = vcmask (!%p388_p2), 900096   ;;  %vm855_vm13 = vcmask (!%p388_p2), 908288  }
   0xb   : > { %v3246_v25 = vld [vmem:[%s4226_s3 + $0xc] sm:$0xf] (!%p388_p2)  ;;  %vm985_vm14 = vcmask (!%p388_p2), 785408   ;;  %vm1117_vm15 = vcmask (!%p388_p2), 769024   ;;  %vm1056_vm2 = vcmask (!%p388_p2), 777216  }
   0xc   : > { %v460_v28 = vand.u32 (!%p388_p2), 15, %v3657_v27  ;;  %vm3674_vm6 = vcmp.ge.s32.totalorder (!%p388_p2), %v453_v33, 1  ;;  %vm3709_vm9 = vcmp.lt.s32.totalorder (!%p388_p2), %v453_v33, 15 }
   0xd   : > { %s4246_s26 = smov (!%p431_p3, %s3223_s26), 1 }
   0xe   : > { %s3356_s29 = sshll.u32 %s4246_s26, 3  ;;  %vm3662_vm5 = vcmp.ge.s32.totalorder %v460_v28, 1  ;;  %vm3720_vm11 = vcmp.lt.s32.totalorder %v460_v28, 15 }
   0xf   : > { %s435_s15 = scalar_lea.vmem %s4223_s0, %s3356_s29  ;;  %s3546_s29 = smov 94  }
  0x10   : > { %v477_v2 = vld [vmem:[%s435_s15] sm:$0xff] }
  0x11   : > { %v3233_v3 = vcombine.high %v477_v2, %v477_v2  ;;  %v3232_v4 = vcombine.low %v477_v2, %v477_v2 }
  0x13   : > { %3234 = vmatprep.subr.msk.bf16.mxu0 %vm494_vm0, %v3233_v3  ;;  %v496_v5 = vsel %vm494_vm0, %v3232_v4, 0 }
  0x14   : > { %502 = vmatpush1.bf16.msra.mxu0 %v496_v5 }
  0x17   : > { %3235 = vmatmul.mubr.msk.bf16.vlgmr.msra.gmra.mrb[0].mxu0 %vm490_vm1, %v478_v6 }
  0x18   : > { %693 = vmatprep.mubr.bf16.mxu0 %v3537_v0 }
  0x86   : > { %v483_v8 = vpop.permute.xlu0 %482 }
  0xea   : > { %v535_v9 = vpop.f32.mrb[0].mxu0 }
  0xeb   : > { %v536_v10 = vadd.f32 %v535_v9, %v483_v8  ;;  %v537_v11 = vpop.f32.mrb[1].mxu0 }
  0xec   : > { %v538_v12 = vadd.f32 %v537_v11, %v483_v8  ;;  %v539_v13 = vpop.f32.mrb[2].mxu0 }
  0xed   : > { %v3236_v14 = vmul.f32 -1.442695, %v536_v10  ;;  %v540_v15 = vpop.f32.mrb[3].mxu0 }
  0xee   : > { %v3237_v16 = vmul.f32 -1.442695, %v538_v12 }
  0xef   : > { %3481 = vpow2.f32 %v3236_v14 }
  0xf0   : > { %3483 = vpow2.f32 %v3237_v16 }
  0xf9   : > { %v3482_v17 = vpop.eup %3481 }
  0xfa   : > { %v3484_v18 = vpop.eup %3483  ;;  %v548_v19 = vadd.f32 1.0, %v3482_v17  ;;  %v3243_v17 = vld [vmem:[%s4226_s3 + $0x8] sm:$0xf] }
  0xfb   : > { %v549_v20 = vadd.f32 1.0, %v3484_v18 }
  0xfc   : > { %3485 = vrcp.f32 %v548_v19 }
  0xfd   : > { %3487 = vrcp.f32 %v549_v20 }
 0x106   : > { %v3486_v21 = vpop.eup %3485 }
 0x107   : > { %v3488_v22 = vpop.eup %3487  ;;  %v3646_v23 = vmul.f32 %v3486_v21, %v536_v10 }
 0x108   : > { %v3648_v24 = vmul.f32 %v3488_v22, %v538_v12 }
 0x109   : > { %560 = vrot.lane.b32.xlu0 %v3646_v23, %s3539_s18 }
 0x10a   : > { %562 = vrot.lane.b32.xlu1 %v3648_v24, %s3539_s18 }
 0x17b   : > { %v561_v29 = vpop.permute.xlu0 %560 }
 0x17c   : > { %570 = vst.msk [vmem:[#allocation3] sm:$0xff] %vm569_vm3, %v561_v29  ;;  %v563_v31 = vpop.permute.xlu1 %562 }
 0x17d   : > { %v565_v32 = vsel %vm564_vm4, %v561_v29, %v563_v31  ;;  %572 = vst.msk [vmem:[#allocation3 + $0x10] sm:$0xff] %vm564_vm4, %v563_v31 }
 0x17e   : > { %v588_v34 = vpack.c.bf16 %v565_v32, %v565_v32  ;;  %v580_v35 = vsel %vm3662_vm5, %v565_v32, 0.0 }
 0x17f   : > { %v583_v36 = vpack.c.bf16 %v580_v35, %v580_v35 }
 0x180   : > { %595 = vrot.lane.b32.xlu0 %v588_v34, %s3540_s19 }
 0x181   : > { %3241 = vmatprep.subr.msk.bf16.mxu0 %vm494_vm0, %v583_v36 }
 0x183   : > { %v573_v38 = vld [vmem:[#allocation3] sm:$0xff] }
 0x184   : > { %v587_v39 = vpack.c.bf16 %v573_v38, %v573_v38  ;;  %v579_v40 = vsel %vm3674_vm6, %v573_v38, 0.0  ;;  %v3378_v41 = vpack.i.bf16 %v565_v32, %v573_v38  ;;  %v584_v42 = vld [vmem:[#allocation3 + $0x10] sm:$0xff] }
 0x185   : > { %v582_v43 = vpack.c.bf16 %v579_v40, %v579_v40  ;;  %v589_v45 = vpack.c.bf16 %v584_v42, %v584_v42 }
 0x186   : > { %593 = vrot.lane.b32.xlu1 %v587_v39, %s3540_s19  ;;  %3379 = vrot.lane.b32.xlu0 %v3378_v41, %s3541_s20 }
 0x187   : > { %v656_v44 = vsel %vm494_vm0, %v582_v43, 0 }
 0x188   : > { %662 = vmatpush1.bf16.msra.mxu0 %v656_v44  ;;  %v3252_v44 = vld [vmem:[%s4226_s3 + $0x14] sm:$0xf] }
 0x18a   : > { %597 = vrot.lane.b32.xlu1 %v589_v45, %s3540_s19  ;;  %3384 = vrot.lane.b32.xlu0 %v3378_v41, %s3542_s23 }
 0x18b   : > { %3242 = vmatmul.mubr.msk.bf16.vlgmr.msra.gmra.mrb[4].mxu0 %vm490_vm1, %v581_v46 }
 0x18c   : > { %836 = vmatprep.mubr.bf16.mxu0 %v3537_v0 }
 0x18e   : > { %713 = vrot.lane.b32.xlu1 %v584_v42, %s3541_s20  ;;  %849 = vrot.lane.b32.xlu0 %v587_v39, %s3543_s24 }
 0x192   : > { %782 = vrot.lane.b32.xlu1 %v584_v42, %s3542_s23  ;;  %853 = vrot.lane.b32.xlu0 %v589_v45, %s3543_s24 }
 0x196   : > { %3389 = vrot.lane.b32.xlu1 %v3378_v41, %s3544_s27  ;;  %914 = vrot.lane.b32.xlu0 %v584_v42, %s3544_s27 }
 0x19a   : > { %851 = vrot.lane.b32.xlu1 %v588_v34, %s3543_s24  ;;  %983 = vrot.lane.b32.xlu0 %v584_v42, %s3545_s28 }
 0x19e   : > { %3394 = vrot.lane.b32.xlu1 %v3378_v41, %s3545_s28  ;;  %1115 = vrot.lane.b32.xlu0 %v584_v42, %s3546_s29 }
 0x1a2   : > { %3399 = vrot.lane.b32.xlu1 %v3378_v41, %s3546_s29  ;;  %1052 = vrot.lane.b32.xlu0 %v588_v34, %s3547_s30 }
 0x1a6   : > { %1050 = vrot.lane.b32.xlu1 %v587_v39, %s3547_s30  ;;  %1183 = vperm.xlu0 %3377, %v1180_v47   ;;  %v3249_v39 = vld [vmem:[%s4226_s3 + $0x10] sm:$0xf] }
 0x1aa   : > { %1054 = vrot.lane.b32.xlu1 %v589_v45, %s3547_s30 }
 0x1f2   : > { %v596_v48 = vpop.permute.xlu0 %595 }
 0x1f8   : > { %v594_v49 = vpop.permute.xlu1 %593  ;;  %v3380_v50 = vpop.permute.xlu0 %3379 }
 0x1f9   : > { %v3382_v51 = vunpack.i.h.bf16 %v3380_v50  ;;  %v3381_v52 = vunpack.i.l.bf16 %v3380_v50  ;;  %v600_v54 = vsel %vm599_vm7, %v594_v49, %v596_v48 }
 0x1fa   : > { %v606_v61 = vsel %vm494_vm0, %v600_v54, 0 }
 0x1fb   : > { %v716_v53 = vsel %vm715_vm8, %v3381_v52, %v3382_v51 }
 0x1fc   : > { %v598_v56 = vpop.permute.xlu1 %597  ;;  %v3385_v57 = vpop.permute.xlu0 %3384  ;;  %v720_v62 = vsel %vm3709_vm9, %v716_v53, 0.0 }
 0x1fd   : > { %v601_v58 = vsel %vm599_vm7, %v596_v48, %v598_v56  ;;  %v3387_v59 = vunpack.i.h.bf16 %v3385_v57  ;;  %v3386_v60 = vunpack.i.l.bf16 %v3385_v57  ;;  %v724_v6 = vpack.c.bf16 %v720_v62, %v720_v62 }
 0x1fe   : > { %3239 = vmatprep.subr.msk.bf16.mxu1 %vm494_vm0, %v601_v58 }
 0x1ff   : > { %612 = vmatpush1.bf16.msra.mxu1 %v606_v61  ;;  %v785_v2 = vsel %vm784_vm10, %v3386_v60, %v3387_v59  ;;  %v730_v13 = vsel %vm494_vm0, %v724_v6, 0  ;;  %v3255_v61 = vld [vmem:[%s4226_s3 + $0x18] sm:$0xf] }
 0x200   : > { %v714_v3 = vpop.permute.xlu1 %713  ;;  %v850_v4 = vpop.permute.xlu0 %849  ;;  %v789_v8 = vsel %vm3674_vm6, %v785_v2, 0.0 }
 0x201   : > { %v717_v5 = vsel %vm715_vm8, %v3382_v51, %v714_v3  ;;  %v793_v14 = vpack.c.bf16 %v789_v8, %v789_v8 }
 0x202   : > { %v721_v7 = vsel %vm3720_vm11, %v717_v5, 0.0  ;;  %3240 = vmatmul.mubr.msk.bf16.vlgmr.msra.gmra.mrb[0].mxu1 %vm490_vm1, %v3238_v1 }
 0x203   : > { %v725_v9 = vpack.c.bf16 %v721_v7, %v721_v7  ;;  %767 = vmatprep.mubr.bf16.mxu1 %v3537_v0  ;;  %v799_v22 = vsel %vm494_vm0, %v793_v14, 0 }
 0x204   : > { %v783_v10 = vpop.permute.xlu1 %782  ;;  %v854_v11 = vpop.permute.xlu0 %853 }
 0x205   : > { %v786_v12 = vsel %vm784_vm10, %v3387_v59, %v783_v10  ;;  %3244 = vmatprep.subr.msk.bf16.mxu1 %vm494_vm0, %v725_v9  ;;  %v3258_v9 = vld [vmem:[%s4226_s3 + $0x1c] sm:$0xf]  ;;  %v3261_v10 = vld [vmem:[%s4226_s3 + $0x20] sm:$0xf] }
 0x206   : > { %v790_v15 = vsel %vm3662_vm5, %v786_v12, 0.0  ;;  %736 = vmatpush1.bf16.msra.mxu1 %v730_v13 }
 0x207   : > { %v794_v16 = vpack.c.bf16 %v790_v15, %v790_v15 }
 0x208   : > { %v3390_v18 = vpop.permute.xlu1 %3389  ;;  %v915_v19 = vpop.permute.xlu0 %914 }
 0x209   : > { %v3392_v20 = vunpack.i.h.bf16 %v3390_v18  ;;  %v3391_v21 = vunpack.i.l.bf16 %v3390_v18  ;;  %3247 = vmatprep.subr.msk.bf16.mxu0 %vm494_vm0, %v794_v16 }
 0x20a   : > { %3245 = vmatmul.mubr.msk.bf16.vlgmr.msra.gmra.mrb[4].mxu1 %vm490_vm1, %v3243_v17  ;;  %805 = vmatpush1.bf16.msra.mxu0 %v799_v22 }
 0x20b   : > { %v917_v26 = vsel %vm916_vm12, %v3391_v21, %v3392_v20  ;;  %v918_v27 = vsel %vm916_vm12, %v3392_v20, %v915_v19  ;;  %899 = vmatprep.mubr.bf16.mxu1 %v3537_v0 }
 0x20c   : > { %v852_v28 = vpop.permute.xlu1 %851  ;;  %v922_v29 = vsel %vm3720_vm11, %v918_v27, 0.0  ;;  %v921_v31 = vsel %vm3709_vm9, %v917_v26, 0.0  ;;  %v984_v38 = vpop.permute.xlu0 %983 }
 0x20d   : > { %v856_v32 = vsel %vm855_vm13, %v850_v4, %v852_v28  ;;  %v857_v33 = vsel %vm855_vm13, %v852_v28, %v854_v11  ;;  %3248 = vmatmul.mubr.msk.bf16.vlgmr.msra.gmra.mrb[8].mxu0 %vm490_vm1, %v3246_v25  ;;  %v926_v34 = vpack.c.bf16 %v922_v29, %v922_v29  ;;  %v925_v35 = vpack.c.bf16 %v921_v31, %v921_v31 }
 0x20e   : > { %v862_v36 = vsel %vm494_vm0, %v856_v32, 0  ;;  %3250 = vmatprep.subr.msk.bf16.mxu1 %vm494_vm0, %v857_v33  ;;  %968 = vmatprep.mubr.bf16.mxu0 %v3537_v0 }
 0x20f   : > { %868 = vmatpush1.bf16.msra.mxu1 %v862_v36  ;;  %3253 = vmatprep.subr.msk.bf16.mxu0 %vm494_vm0, %v926_v34  ;;  %v931_v40 = vsel %vm494_vm0, %v925_v35, 0 }
 0x210   : > { %v3395_v41 = vpop.permute.xlu1 %3394  ;;  %937 = vmatpush1.bf16.msra.mxu0 %v931_v40  ;;  %v1116_v49 = vpop.permute.xlu0 %1115 }
 0x211   : > { %v3397_v42 = vunpack.i.h.bf16 %v3395_v41  ;;  %v3396_v43 = vunpack.i.l.bf16 %v3395_v41 }
 0x212   : > { %3251 = vmatmul.mubr.msk.bf16.vlgmr.msra.gmra.mrb[8].mxu1 %vm490_vm1, %v3249_v39 }
 0x213   : > { %v986_v45 = vsel %vm985_vm14, %v3396_v43, %v3397_v42  ;;  %v987_v46 = vsel %vm985_vm14, %v3397_v42, %v984_v38  ;;  %1037 = vmatprep.mubr.bf16.mxu1 %v3537_v0 }
 0x214   : > { %v991_v47 = vsel %vm3662_vm5, %v987_v46, 0.0  ;;  %v3400_v48 = vpop.permute.xlu1 %3399  ;;  %v990_v50 = vsel %vm3674_vm6, %v986_v45, 0.0  ;;  %v1053_v3 = vpop.permute.xlu0 %1052 }
 0x215   : > { %v995_v51 = vpack.c.bf16 %v991_v47, %v991_v47  ;;  %v3402_v52 = vunpack.i.h.bf16 %v3400_v48  ;;  %v3401_v53 = vunpack.i.l.bf16 %v3400_v48  ;;  %3254 = vmatmul.mubr.msk.bf16.vlgmr.msra.gmra.mrb[12].mxu0 %vm490_vm1, %v3252_v44  ;;  %v994_v54 = vpack.c.bf16 %v990_v50, %v990_v50 }
 0x216   : > { %1100 = vmatprep.mubr.bf16.mxu0 %v3537_v0 }
 0x217   : > { %v1118_v56 = vsel %vm1117_vm15, %v3401_v53, %v3402_v52  ;;  %v1119_v57 = vsel %vm1117_vm15, %v3402_v52, %v1116_v49  ;;  %3256 = vmatprep.subr.msk.bf16.mxu1 %vm494_vm0, %v995_v51  ;;  %v1000_v58 = vsel %vm494_vm0, %v994_v54, 0 }
 0x218   : > { %v1123_v59 = vsel %vm3720_vm11, %v1119_v57, 0.0  ;;  %v1051_v60 = vpop.permute.xlu1 %1050  ;;  %1006 = vmatpush1.bf16.msra.mxu1 %v1000_v58  ;;  %v1122_v62 = vsel %vm3709_vm9, %v1118_v56, 0.0 }
 0x219   : > { %v1127_v1 = vpack.c.bf16 %v1123_v59, %v1123_v59  ;;  %v1126_v2 = vpack.c.bf16 %v1122_v62, %v1122_v62  ;;  %v1057_v4 = vsel %vm1056_vm2, %v1051_v60, %v1053_v3 }
 0x21a   : > { %v1063_v8 = vsel %vm494_vm0, %v1057_v4, 0 }
 0x21b   : > { %3257 = vmatmul.mubr.msk.bf16.vlgmr.msra.gmra.mrb[12].mxu1 %vm490_vm1, %v3255_v61  ;;  %3262 = vmatprep.subr.msk.bf16.mxu1 %vm494_vm0, %v1127_v1  ;;  %v1132_v5 = vsel %vm494_vm0, %v1126_v2, 0 }
 0x21c   : > { %v1055_v6 = vpop.permute.xlu1 %1054  ;;  %1138 = vmatpush1.bf16.msra.mxu1 %v1132_v5  ;;  %1169 = vmatprep.mubr.bf16.mxu1 %v3537_v0 }
 0x21d   : > { %v1058_v7 = vsel %vm1056_vm2, %v1053_v3, %v1055_v6 }
 0x21e   : > { %3259 = vmatprep.subr.msk.bf16.mxu0 %vm494_vm0, %v1058_v7 }
 0x21f   : > { %1069 = vmatpush1.bf16.msra.mxu0 %v1063_v8 }
 0x222   : > { %3260 = vmatmul.mubr.msk.bf16.vlgmr.msra.gmra.mrb[16].mxu0 %vm490_vm1, %v3258_v9 }
 0x223   : > { %3263 = vmatmul.mubr.msk.bf16.vlgmr.msra.gmra.mrb[16].mxu1 %vm490_vm1, %v3261_v10  ;;  %1280 = vmatprep.mubr.bf16.mxu0 %v3537_v0 }
 0x224   : > { %1330 = vmatprep.mubr.bf16.mxu1 %v3537_v0 }
 0x225   : > { %v1184_v4 = vpop.permute.xlu0 %1183 }
 0x25e   : > { %v695_v11 = vpop.f32.mrb[4].mxu0 }
 0x25f   : > { %v697_v12 = vpop.f32.mrb[5].mxu0 }
 0x260   : > { %v699_v13 = vpop.f32.mrb[6].mxu0 }
 0x261   : > { %v700_v14 = vpop.f32.mrb[7].mxu0 }
 0x2d5   : > { %v645_v15 = vpop.f32.mrb[0].mxu1 }
 0x2d6   : > { %v647_v16 = vpop.f32.mrb[1].mxu1  ;;  %v696_v17 = vadd.f32 %v695_v11, %v645_v15 }
 0x2d7   : > { %v649_v18 = vpop.f32.mrb[2].mxu1  ;;  %v698_v19 = vadd.f32 %v697_v12, %v647_v16 }
 0x2d8   : > { %v650_v20 = vpop.f32.mrb[3].mxu1 }
 0x2dd   : > { %v769_v21 = vpop.f32.mrb[4].mxu1 }
 0x2de   : > { %v776_v22 = vadd.f32 %v769_v21, %v696_v17  ;;  %v771_v25 = vpop.f32.mrb[5].mxu1 }
 0x2df   : > { %v777_v26 = vadd.f32 %v771_v25, %v698_v19  ;;  %v773_v27 = vpop.f32.mrb[6].mxu1 }
 0x2e0   : > { %v774_v28 = vpop.f32.mrb[7].mxu1  ;;  %v838_v29 = vpop.f32.mrb[8].mxu0 }
 0x2e1   : > { %v845_v31 = vadd.f32 %v838_v29, %v776_v22  ;;  %v840_v32 = vpop.f32.mrb[9].mxu0 }
 0x2e2   : > { %v846_v33 = vadd.f32 %v840_v32, %v777_v26  ;;  %v842_v34 = vpop.f32.mrb[10].mxu0 }
 0x2e3   : > { %v843_v35 = vpop.f32.mrb[11].mxu0 }
 0x2e5   : > { %v901_v36 = vpop.f32.mrb[8].mxu1 }
 0x2e6   : > { %v908_v38 = vadd.f32 %v901_v36, %v845_v31  ;;  %v903_v39 = vpop.f32.mrb[9].mxu1  ;;  %v1219_v36 = vld [vmem:[%s4228_s5] sm:$0xf] }
 0x2e7   : > { %v909_v40 = vadd.f32 %v903_v39, %v846_v33  ;;  %v905_v41 = vpop.f32.mrb[10].mxu1 }
 0x2e8   : > { %v906_v42 = vpop.f32.mrb[11].mxu1  ;;  %v970_v43 = vpop.f32.mrb[12].mxu0 }
 0x2e9   : > { %v977_v44 = vadd.f32 %v970_v43, %v908_v38  ;;  %v972_v45 = vpop.f32.mrb[13].mxu0  ;;  %v1806_v38 = vld [vmem:[%s4229_s6] sm:$0xff] }
 0x2ea   : > { %v978_v46 = vadd.f32 %v972_v45, %v909_v40  ;;  %v974_v47 = vpop.f32.mrb[14].mxu0 }
 0x2eb   : > { %v975_v48 = vpop.f32.mrb[15].mxu0 }
 0x2ee   : > { %v1039_v49 = vpop.f32.mrb[12].mxu1 }
 0x2ef   : > { %v1046_v50 = vadd.f32 %v1039_v49, %v977_v44  ;;  %v1041_v51 = vpop.f32.mrb[13].mxu1 }
 0x2f0   : > { %v1047_v52 = vadd.f32 %v1041_v51, %v978_v46  ;;  %v1043_v53 = vpop.f32.mrb[14].mxu1 }
 0x2f1   : > { %v1044_v54 = vpop.f32.mrb[15].mxu1  ;;  %v3266_v53 = vld [vmem:[%s4228_s5 + $0x4] sm:$0xf] }
 0x2f5   : > { %v1102_v56 = vpop.f32.mrb[16].mxu0 }
 0x2f6   : > { %v1109_v57 = vadd.f32 %v1102_v56, %v1046_v50  ;;  %v1104_v58 = vpop.f32.mrb[17].mxu0  ;;  %v1171_v59 = vpop.f32.mrb[16].mxu1 }
 0x2f7   : > { %v1110_v60 = vadd.f32 %v1104_v58, %v1047_v52  ;;  %v1106_v61 = vpop.f32.mrb[18].mxu0  ;;  %v1173_v62 = vpop.f32.mrb[17].mxu1 }
 0x2f8   : > { %v1178_v1 = vadd.f32 %v1171_v59, %v1109_v57  ;;  %v1107_v2 = vpop.f32.mrb[19].mxu0  ;;  %v1175_v3 = vpop.f32.mrb[18].mxu1 }
 0x2f9   : > { %v1179_v5 = vadd.f32 %v1173_v62, %v1110_v60  ;;  %v1176_v6 = vpop.f32.mrb[19].mxu1 }
 0x2fa   : > { %v1186_v7 = vadd.f32 %v1184_v4, %v1178_v1 }
 0x2fb   : > { %v1187_v8 = vadd.f32 %v1184_v4, %v1179_v5 }
 0x2fc   : > { %v3264_v9 = vmul.f32 -1.442695, %v1186_v7 }
 0x2fd   : > { %v3265_v10 = vmul.f32 -1.442695, %v1187_v8 }
 0x2fe   : > { %3489 = vpow2.f32 %v3264_v9 }
 0x2ff   : > { %3491 = vpow2.f32 %v3265_v10 }
 0x308   : > { %v3490_v11 = vpop.eup %3489 }
 0x309   : > { %v3492_v12 = vpop.eup %3491  ;;  %v1194_v13 = vadd.f32 1.0, %v3490_v11 }
 0x30a   : > { %v1195_v14 = vadd.f32 1.0, %v3492_v12 }
 0x30b   : > { %3493 = vrcp.f32 %v1194_v13 }
 0x30c   : > { %3495 = vrcp.f32 %v1195_v14  ;;  %v3274_v14 = vld [vmem:[%s4228_s5 + $0xc] sm:$0xf] }
 0x315   : > { %v3494_v15 = vpop.eup %3493 }
 0x316   : > { %v3496_v16 = vpop.eup %3495  ;;  %v1200_v17 = vmul.f32 %v3494_v15, %v1186_v7 }
 0x317   : > { %v1201_v18 = vmul.f32 %v3496_v16, %v1187_v8  ;;  %v3271_v8 = vld [vmem:[%s4228_s5 + $0x8] sm:$0xf] }
 0x318   : > { %1204 = vrot.lane.b32.xlu1 %v1200_v17, %s3539_s18 }
 0x319   : > { %1206 = vrot.lane.b32.xlu0 %v1201_v18, %s3539_s18 }
 0x38a   : > { %v1205_v19 = vpop.permute.xlu1 %1204 }
 0x38b   : > { %1212 = vst.msk [vmem:[#allocation3] sm:$0xff] %vm569_vm3, %v1205_v19  ;;  %v1207_v20 = vpop.permute.xlu0 %1206 }
 0x38c   : > { %v1208_v21 = vsel %vm564_vm4, %v1205_v19, %v1207_v20  ;;  %1214 = vst.msk [vmem:[#allocation3 + $0x10] sm:$0xff] %vm564_vm4, %v1207_v20 }
 0x38d   : > { %v1226_v22 = vpack.c.bf16 %v1208_v21, %v1208_v21  ;;  %v1218_v25 = vsel %vm3662_vm5, %v1208_v21, 0.0 }
 0x38e   : > { %v1221_v26 = vpack.c.bf16 %v1218_v25, %v1218_v25 }
 0x38f   : > { %1233 = vrot.lane.b32.xlu0 %v1226_v22, %s3540_s19 }
 0x390   : > { %3269 = vmatprep.subr.msk.bf16.mxu1 %vm494_vm0, %v1221_v26 }
 0x392   : > { %v1215_v27 = vld [vmem:[#allocation3] sm:$0xff] }
 0x393   : > { %v1225_v28 = vpack.c.bf16 %v1215_v27, %v1215_v27  ;;  %v1217_v29 = vsel %vm3674_vm6, %v1215_v27, 0.0  ;;  %v3403_v31 = vpack.i.bf16 %v1208_v21, %v1215_v27  ;;  %v1222_v32 = vld [vmem:[#allocation3 + $0x10] sm:$0xff] }
 0x394   : > { %v1220_v33 = vpack.c.bf16 %v1217_v29, %v1217_v29  ;;  %v1227_v35 = vpack.c.bf16 %v1222_v32, %v1222_v32 }
 0x395   : > { %1231 = vrot.lane.b32.xlu1 %v1225_v28, %s3540_s19  ;;  %3404 = vrot.lane.b32.xlu0 %v3403_v31, %s3541_s20 }
 0x396   : > { %v1293_v34 = vsel %vm494_vm0, %v1220_v33, 0 }
 0x397   : > { %1299 = vmatpush1.bf16.msra.mxu1 %v1293_v34  ;;  %v3280_v34 = vld [vmem:[%s4228_s5 + $0x14] sm:$0xf] }
 0x399   : > { %1235 = vrot.lane.b32.xlu1 %v1227_v35, %s3540_s19  ;;  %3409 = vrot.lane.b32.xlu0 %v3403_v31, %s3542_s23 }
 0x39a   : > { %3270 = vmatmul.mubr.msk.bf16.vlgmr.msra.gmra.mrb[20].mxu1 %vm490_vm1, %v1219_v36 }
 0x39b   : > { %1467 = vmatprep.mubr.bf16.mxu1 %v3537_v0 }
 0x39d   : > { %1346 = vrot.lane.b32.xlu1 %v1222_v32, %s3541_s20  ;;  %1480 = vrot.lane.b32.xlu0 %v1225_v28, %s3543_s24 }
 0x3a1   : > { %1414 = vrot.lane.b32.xlu1 %v1222_v32, %s3542_s23  ;;  %1484 = vrot.lane.b32.xlu0 %v1227_v35, %s3543_s24 }
 0x3a5   : > { %3414 = vrot.lane.b32.xlu1 %v3403_v31, %s3544_s27  ;;  %1544 = vrot.lane.b32.xlu0 %v1222_v32, %s3544_s27 }
 0x3a9   : > { %1482 = vrot.lane.b32.xlu1 %v1226_v22, %s3543_s24  ;;  %1612 = vrot.lane.b32.xlu0 %v1222_v32, %s3545_s28 }
 0x3ad   : > { %3419 = vrot.lane.b32.xlu1 %v3403_v31, %s3545_s28  ;;  %1742 = vrot.lane.b32.xlu0 %v1222_v32, %s3546_s29 }
 0x3b1   : > { %3424 = vrot.lane.b32.xlu1 %v3403_v31, %s3546_s29  ;;  %1680 = vrot.lane.b32.xlu0 %v1226_v22, %s3547_s30 }
 0x3b5   : > { %1678 = vrot.lane.b32.xlu1 %v1225_v28, %s3547_s30  ;;  %1809 = vperm.xlu0 %3377, %v1806_v38   ;;  %v3277_v28 = vld [vmem:[%s4228_s5 + $0x10] sm:$0xf] }
 0x3b9   : > { %1682 = vrot.lane.b32.xlu1 %v1227_v35, %s3547_s30 }
 0x401   : > { %v1234_v39 = vpop.permute.xlu0 %1233 }
 0x407   : > { %v1232_v40 = vpop.permute.xlu1 %1231  ;;  %v3405_v41 = vpop.permute.xlu0 %3404 }
 0x408   : > { %v3407_v42 = vunpack.i.h.bf16 %v3405_v41  ;;  %v3406_v43 = vunpack.i.l.bf16 %v3405_v41  ;;  %v1237_v44 = vsel %vm599_vm7, %v1232_v40, %v1234_v39 }
 0x409   : > { %v1243_v51 = vsel %vm494_vm0, %v1237_v44, 0 }
 0x40a   : > { %v1348_v45 = vsel %vm715_vm8, %v3406_v43, %v3407_v42 }
 0x40b   : > { %v1236_v46 = vpop.permute.xlu1 %1235  ;;  %v3410_v47 = vpop.permute.xlu0 %3409  ;;  %v1352_v52 = vsel %vm3709_vm9, %v1348_v45, 0.0 }
 0x40c   : > { %v1238_v48 = vsel %vm599_vm7, %v1234_v39, %v1236_v46  ;;  %v3412_v49 = vunpack.i.h.bf16 %v3410_v47  ;;  %v3411_v50 = vunpack.i.l.bf16 %v3410_v47  ;;  %v1356_v59 = vpack.c.bf16 %v1352_v52, %v1352_v52 }
 0x40d   : > { %3267 = vmatprep.subr.msk.bf16.mxu0 %vm494_vm0, %v1238_v48 }
 0x40e   : > { %1249 = vmatpush1.bf16.msra.mxu0 %v1243_v51  ;;  %v1416_v54 = vsel %vm784_vm10, %v3411_v50, %v3412_v49  ;;  %v1362_v4 = vsel %vm494_vm0, %v1356_v59, 0  ;;  %v3283_v51 = vld [vmem:[%s4228_s5 + $0x18] sm:$0xf] }
 0x40f   : > { %v1347_v56 = vpop.permute.xlu1 %1346  ;;  %v1481_v57 = vpop.permute.xlu0 %1480  ;;  %v1420_v61 = vsel %vm3674_vm6, %v1416_v54, 0.0 }
 0x410   : > { %v1349_v58 = vsel %vm715_vm8, %v3407_v42, %v1347_v56  ;;  %v1424_v5 = vpack.c.bf16 %v1420_v61, %v1420_v61 }
 0x411   : > { %v1353_v60 = vsel %vm3720_vm11, %v1349_v58, 0.0  ;;  %3268 = vmatmul.mubr.msk.bf16.vlgmr.msra.gmra.mrb[20].mxu0 %vm490_vm1, %v3266_v53 }
 0x412   : > { %v1357_v62 = vpack.c.bf16 %v1353_v60, %v1353_v60  ;;  %1399 = vmatprep.mubr.bf16.mxu0 %v3537_v0  ;;  %v1430_v13 = vsel %vm494_vm0, %v1424_v5, 0 }
 0x413   : > { %v1415_v1 = vpop.permute.xlu1 %1414  ;;  %v1485_v2 = vpop.permute.xlu0 %1484 }
 0x414   : > { %v1417_v3 = vsel %vm784_vm10, %v3412_v49, %v1415_v1  ;;  %3272 = vmatprep.subr.msk.bf16.mxu0 %vm494_vm0, %v1357_v62  ;;  %v3286_v62 = vld [vmem:[%s4228_s5 + $0x1c] sm:$0xf]  ;;  %v3289_v1 = vld [vmem:[%s4228_s5 + $0x20] sm:$0xf] }
 0x415   : > { %v1421_v6 = vsel %vm3662_vm5, %v1417_v3, 0.0  ;;  %1368 = vmatpush1.bf16.msra.mxu0 %v1362_v4 }
 0x416   : > { %v1425_v7 = vpack.c.bf16 %v1421_v6, %v1421_v6 }
 0x417   : > { %v3415_v9 = vpop.permute.xlu1 %3414  ;;  %v1545_v10 = vpop.permute.xlu0 %1544 }
 0x418   : > { %v3417_v11 = vunpack.i.h.bf16 %v3415_v9  ;;  %v3416_v12 = vunpack.i.l.bf16 %v3415_v9  ;;  %3275 = vmatprep.subr.msk.bf16.mxu1 %vm494_vm0, %v1425_v7 }
 0x419   : > { %3273 = vmatmul.mubr.msk.bf16.vlgmr.msra.gmra.mrb[24].mxu0 %vm490_vm1, %v3271_v8  ;;  %1436 = vmatpush1.bf16.msra.mxu1 %v1430_v13 }
 0x41a   : > { %v1546_v15 = vsel %vm916_vm12, %v3416_v12, %v3417_v11  ;;  %v1547_v16 = vsel %vm916_vm12, %v3417_v11, %v1545_v10  ;;  %1529 = vmatprep.mubr.bf16.mxu0 %v3537_v0 }
 0x41b   : > { %v1483_v17 = vpop.permute.xlu1 %1482  ;;  %v1551_v18 = vsel %vm3720_vm11, %v1547_v16, 0.0  ;;  %v1550_v19 = vsel %vm3709_vm9, %v1546_v15, 0.0  ;;  %v1613_v27 = vpop.permute.xlu0 %1612 }
 0x41c   : > { %v1486_v20 = vsel %vm855_vm13, %v1481_v57, %v1483_v17  ;;  %v1487_v21 = vsel %vm855_vm13, %v1483_v17, %v1485_v2  ;;  %3276 = vmatmul.mubr.msk.bf16.vlgmr.msra.gmra.mrb[24].mxu1 %vm490_vm1, %v3274_v14  ;;  %v1555_v22 = vpack.c.bf16 %v1551_v18, %v1551_v18  ;;  %v1554_v25 = vpack.c.bf16 %v1550_v19, %v1550_v19 }
 0x41d   : > { %v1492_v26 = vsel %vm494_vm0, %v1486_v20, 0  ;;  %3278 = vmatprep.subr.msk.bf16.mxu0 %vm494_vm0, %v1487_v21  ;;  %1597 = vmatprep.mubr.bf16.mxu1 %v3537_v0 }
 0x41e   : > { %1498 = vmatpush1.bf16.msra.mxu0 %v1492_v26  ;;  %3281 = vmatprep.subr.msk.bf16.mxu1 %vm494_vm0, %v1555_v22  ;;  %v1560_v29 = vsel %vm494_vm0, %v1554_v25, 0 }
 0x41f   : > { %v3420_v31 = vpop.permute.xlu1 %3419  ;;  %1566 = vmatpush1.bf16.msra.mxu1 %v1560_v29  ;;  %v1743_v40 = vpop.permute.xlu0 %1742 }
 0x420   : > { %v3422_v32 = vunpack.i.h.bf16 %v3420_v31  ;;  %v3421_v33 = vunpack.i.l.bf16 %v3420_v31 }
 0x421   : > { %3279 = vmatmul.mubr.msk.bf16.vlgmr.msra.gmra.mrb[28].mxu0 %vm490_vm1, %v3277_v28 }
 0x422   : > { %v1614_v35 = vsel %vm985_vm14, %v3421_v33, %v3422_v32  ;;  %v1615_v36 = vsel %vm985_vm14, %v3422_v32, %v1613_v27  ;;  %1665 = vmatprep.mubr.bf16.mxu0 %v3537_v0 }
 0x423   : > { %v1619_v38 = vsel %vm3662_vm5, %v1615_v36, 0.0  ;;  %v3425_v39 = vpop.permute.xlu1 %3424  ;;  %v1618_v41 = vsel %vm3674_vm6, %v1614_v35, 0.0  ;;  %v1681_v56 = vpop.permute.xlu0 %1680 }
 0x424   : > { %v1623_v42 = vpack.c.bf16 %v1619_v38, %v1619_v38  ;;  %v3427_v43 = vunpack.i.h.bf16 %v3425_v39  ;;  %v3426_v44 = vunpack.i.l.bf16 %v3425_v39  ;;  %3282 = vmatmul.mubr.msk.bf16.vlgmr.msra.gmra.mrb[28].mxu1 %vm490_vm1, %v3280_v34  ;;  %v1622_v45 = vpack.c.bf16 %v1618_v41, %v1618_v41 }
 0x425   : > { %1727 = vmatprep.mubr.bf16.mxu1 %v3537_v0 }
 0x426   : > { %v1744_v46 = vsel %vm1117_vm15, %v3426_v44, %v3427_v43  ;;  %v1745_v47 = vsel %vm1117_vm15, %v3427_v43, %v1743_v40  ;;  %3284 = vmatprep.subr.msk.bf16.mxu0 %vm494_vm0, %v1623_v42  ;;  %v1628_v48 = vsel %vm494_vm0, %v1622_v45, 0 }
 0x427   : > { %v1749_v49 = vsel %vm3720_vm11, %v1745_v47, 0.0  ;;  %v1679_v50 = vpop.permute.xlu1 %1678  ;;  %1634 = vmatpush1.bf16.msra.mxu0 %v1628_v48  ;;  %v1748_v52 = vsel %vm3709_vm9, %v1744_v46, 0.0 }
 0x428   : > { %v1753_v53 = vpack.c.bf16 %v1749_v49, %v1749_v49  ;;  %v1752_v54 = vpack.c.bf16 %v1748_v52, %v1748_v52  ;;  %v1684_v57 = vsel %vm1056_vm2, %v1679_v50, %v1681_v56 }
 0x429   : > { %v1690_v61 = vsel %vm494_vm0, %v1684_v57, 0 }
 0x42a   : > { %3285 = vmatmul.mubr.msk.bf16.vlgmr.msra.gmra.mrb[32].mxu0 %vm490_vm1, %v3283_v51  ;;  %3290 = vmatprep.subr.msk.bf16.mxu0 %vm494_vm0, %v1753_v53  ;;  %v1758_v58 = vsel %vm494_vm0, %v1752_v54, 0 }
 0x42b   : > { %v1683_v59 = vpop.permute.xlu1 %1682  ;;  %1764 = vmatpush1.bf16.msra.mxu0 %v1758_v58  ;;  %1795 = vmatprep.mubr.bf16.mxu0 %v3537_v0 }
 0x42c   : > { %v1685_v60 = vsel %vm1056_vm2, %v1681_v56, %v1683_v59 }
 0x42d   : > { %3287 = vmatprep.subr.msk.bf16.mxu1 %vm494_vm0, %v1685_v60 }
 0x42e   : > { %1696 = vmatpush1.bf16.msra.mxu1 %v1690_v61 }
 0x431   : > { %3288 = vmatmul.mubr.msk.bf16.vlgmr.msra.gmra.mrb[32].mxu1 %vm490_vm1, %v3286_v62 }
 0x432   : > { %3291 = vmatmul.mubr.msk.bf16.vlgmr.msra.gmra.mrb[36].mxu0 %vm490_vm1, %v3289_v1  ;;  %1908 = vmatprep.mubr.bf16.mxu1 %v3537_v0 }
 0x433   : > { %1958 = vmatprep.mubr.bf16.mxu0 %v3537_v0 }
 0x434   : > { %v1810_v57 = vpop.permute.xlu0 %1809 }
 0x46d   : > { %v1332_v2 = vpop.f32.mrb[20].mxu1 }
 0x46e   : > { %v1334_v3 = vpop.f32.mrb[21].mxu1 }
 0x46f   : > { %v1336_v4 = vpop.f32.mrb[22].mxu1 }
 0x470   : > { %v1337_v5 = vpop.f32.mrb[23].mxu1 }
 0x4e4   : > { %v1282_v6 = vpop.f32.mrb[20].mxu0 }
 0x4e5   : > { %v1284_v7 = vpop.f32.mrb[21].mxu0  ;;  %v1333_v8 = vadd.f32 %v1332_v2, %v1282_v6 }
 0x4e6   : > { %v1286_v9 = vpop.f32.mrb[22].mxu0  ;;  %v1335_v10 = vadd.f32 %v1334_v3, %v1284_v7 }
 0x4e7   : > { %v1287_v11 = vpop.f32.mrb[23].mxu0 }
 0x4ec   : > { %v1401_v12 = vpop.f32.mrb[24].mxu0 }
 0x4ed   : > { %v1408_v13 = vadd.f32 %v1401_v12, %v1333_v8  ;;  %v1403_v14 = vpop.f32.mrb[25].mxu0 }
 0x4ee   : > { %v1409_v15 = vadd.f32 %v1403_v14, %v1335_v10  ;;  %v1405_v16 = vpop.f32.mrb[26].mxu0 }
 0x4ef   : > { %v1406_v17 = vpop.f32.mrb[27].mxu0  ;;  %v1469_v18 = vpop.f32.mrb[24].mxu1 }
 0x4f0   : > { %v1476_v19 = vadd.f32 %v1469_v18, %v1408_v13  ;;  %v1471_v20 = vpop.f32.mrb[25].mxu1 }
 0x4f1   : > { %v1477_v21 = vadd.f32 %v1471_v20, %v1409_v15  ;;  %v1473_v22 = vpop.f32.mrb[26].mxu1 }
 0x4f2   : > { %v1474_v25 = vpop.f32.mrb[27].mxu1 }
 0x4f4   : > { %v1531_v26 = vpop.f32.mrb[28].mxu0 }
 0x4f5   : > { %v1538_v27 = vadd.f32 %v1531_v26, %v1476_v19  ;;  %v1533_v28 = vpop.f32.mrb[29].mxu0  ;;  %v1847_v26 = vld [vmem:[%s4230_s7] sm:$0xf] }
 0x4f6   : > { %v1539_v29 = vadd.f32 %v1533_v28, %v1477_v21  ;;  %v1535_v31 = vpop.f32.mrb[30].mxu0 }
 0x4f7   : > { %v1536_v32 = vpop.f32.mrb[31].mxu0  ;;  %v1599_v33 = vpop.f32.mrb[28].mxu1 }
 0x4f8   : > { %v1606_v34 = vadd.f32 %v1599_v33, %v1538_v27  ;;  %v1601_v35 = vpop.f32.mrb[29].mxu1  ;;  %v2434_v27 = vld [vmem:[%s4231_s8] sm:$0xff] }
 0x4f9   : > { %v1607_v36 = vadd.f32 %v1601_v35, %v1539_v29  ;;  %v1603_v38 = vpop.f32.mrb[30].mxu1 }
 0x4fa   : > { %v1604_v39 = vpop.f32.mrb[31].mxu1 }
 0x4fd   : > { %v1667_v40 = vpop.f32.mrb[32].mxu0 }
 0x4fe   : > { %v1674_v41 = vadd.f32 %v1667_v40, %v1606_v34  ;;  %v1669_v42 = vpop.f32.mrb[33].mxu0 }
 0x4ff   : > { %v1675_v43 = vadd.f32 %v1669_v42, %v1607_v36  ;;  %v1671_v44 = vpop.f32.mrb[34].mxu0 }
 0x500   : > { %v1672_v45 = vpop.f32.mrb[35].mxu0  ;;  %v3294_v44 = vld [vmem:[%s4230_s7 + $0x4] sm:$0xf] }
 0x504   : > { %v1729_v46 = vpop.f32.mrb[32].mxu1 }
 0x505   : > { %v1736_v47 = vadd.f32 %v1729_v46, %v1674_v41  ;;  %v1731_v48 = vpop.f32.mrb[33].mxu1  ;;  %v1797_v49 = vpop.f32.mrb[36].mxu0 }
 0x506   : > { %v1737_v50 = vadd.f32 %v1731_v48, %v1675_v43  ;;  %v1733_v51 = vpop.f32.mrb[34].mxu1  ;;  %v1799_v52 = vpop.f32.mrb[37].mxu0 }
 0x507   : > { %v1804_v53 = vadd.f32 %v1797_v49, %v1736_v47  ;;  %v1734_v54 = vpop.f32.mrb[35].mxu1  ;;  %v1801_v56 = vpop.f32.mrb[38].mxu0 }
 0x508   : > { %v1805_v58 = vadd.f32 %v1799_v52, %v1737_v50  ;;  %v1802_v59 = vpop.f32.mrb[39].mxu0 }
 0x509   : > { %v1812_v60 = vadd.f32 %v1810_v57, %v1804_v53 }
 0x50a   : > { %v1813_v61 = vadd.f32 %v1810_v57, %v1805_v58 }
 0x50b   : > { %v3292_v62 = vmul.f32 -1.442695, %v1812_v60 }
 0x50c   : > { %v3293_v1 = vmul.f32 -1.442695, %v1813_v61 }
 0x50d   : > { %3497 = vpow2.f32 %v3292_v62 }
 0x50e   : > { %3499 = vpow2.f32 %v3293_v1 }
 0x517   : > { %v3498_v2 = vpop.eup %3497 }
 0x518   : > { %v3500_v3 = vpop.eup %3499  ;;  %v1820_v4 = vadd.f32 1.0, %v3498_v2 }
 0x519   : > { %v1821_v5 = vadd.f32 1.0, %v3500_v3 }
 0x51a   : > { %3501 = vrcp.f32 %v1820_v4 }
 0x51b   : > { %3503 = vrcp.f32 %v1821_v5  ;;  %v3302_v5 = vld [vmem:[%s4230_s7 + $0xc] sm:$0xf] }
 0x524   : > { %v3502_v6 = vpop.eup %3501 }
 0x525   : > { %v3504_v7 = vpop.eup %3503  ;;  %v3939_v8 = vmul.f32 %v3502_v6, %v1812_v60 }
 0x526   : > { %v3941_v9 = vmul.f32 %v3504_v7, %v1813_v61  ;;  %v3299_v61 = vld [vmem:[%s4230_s7 + $0x8] sm:$0xf] }
 0x527   : > { %1832 = vrot.lane.b32.xlu1 %v3939_v8, %s3539_s18 }
 0x528   : > { %1834 = vrot.lane.b32.xlu0 %v3941_v9, %s3539_s18 }
 0x599   : > { %v1833_v10 = vpop.permute.xlu1 %1832 }
 0x59a   : > { %1840 = vst.msk [vmem:[#allocation3] sm:$0xff] %vm569_vm3, %v1833_v10  ;;  %v1835_v11 = vpop.permute.xlu0 %1834 }
 0x59b   : > { %v1836_v12 = vsel %vm564_vm4, %v1833_v10, %v1835_v11  ;;  %1842 = vst.msk [vmem:[#allocation3 + $0x10] sm:$0xff] %vm564_vm4, %v1835_v11 }
 0x59c   : > { %v1854_v13 = vpack.c.bf16 %v1836_v12, %v1836_v12  ;;  %v1846_v14 = vsel %vm3662_vm5, %v1836_v12, 0.0 }
 0x59d   : > { %v1849_v15 = vpack.c.bf16 %v1846_v14, %v1846_v14 }
 0x59e   : > { %1861 = vrot.lane.b32.xlu0 %v1854_v13, %s3540_s19 }
 0x59f   : > { %3297 = vmatprep.subr.msk.bf16.mxu0 %vm494_vm0, %v1849_v15 }
 0x5a1   : > { %v1843_v16 = vld [vmem:[#allocation3] sm:$0xff] }
 0x5a2   : > { %v1853_v17 = vpack.c.bf16 %v1843_v16, %v1843_v16  ;;  %v1845_v18 = vsel %vm3674_vm6, %v1843_v16, 0.0  ;;  %v3428_v19 = vpack.i.bf16 %v1836_v12, %v1843_v16  ;;  %v1850_v20 = vld [vmem:[#allocation3 + $0x10] sm:$0xff] }
 0x5a3   : > { %v1848_v21 = vpack.c.bf16 %v1845_v18, %v1845_v18  ;;  %v1855_v25 = vpack.c.bf16 %v1850_v20, %v1850_v20 }
 0x5a4   : > { %1859 = vrot.lane.b32.xlu1 %v1853_v17, %s3540_s19  ;;  %3429 = vrot.lane.b32.xlu0 %v3428_v19, %s3541_s20 }
 0x5a5   : > { %v1921_v22 = vsel %vm494_vm0, %v1848_v21, 0 }
 0x5a6   : > { %1927 = vmatpush1.bf16.msra.mxu0 %v1921_v22 }
 0x5a8   : > { %1863 = vrot.lane.b32.xlu1 %v1855_v25, %s3540_s19  ;;  %3434 = vrot.lane.b32.xlu0 %v3428_v19, %s3542_s23 }
 0x5a9   : > { %3298 = vmatmul.mubr.msk.bf16.vlgmr.msra.gmra.mrb[40].mxu0 %vm490_vm1, %v1847_v26  ;;  %v3308_v26 = vld [vmem:[%s4230_s7 + $0x14] sm:$0xf] }
 0x5aa   : > { %2095 = vmatprep.mubr.bf16.mxu0 %v3537_v0 }
 0x5ac   : > { %1974 = vrot.lane.b32.xlu1 %v1850_v20, %s3541_s20  ;;  %2108 = vrot.lane.b32.xlu0 %v1853_v17, %s3543_s24 }
 0x5b0   : > { %2042 = vrot.lane.b32.xlu1 %v1850_v20, %s3542_s23  ;;  %2112 = vrot.lane.b32.xlu0 %v1855_v25, %s3543_s24 }
 0x5b4   : > { %3439 = vrot.lane.b32.xlu1 %v3428_v19, %s3544_s27  ;;  %2172 = vrot.lane.b32.xlu0 %v1850_v20, %s3544_s27 }
 0x5b8   : > { %2110 = vrot.lane.b32.xlu1 %v1854_v13, %s3543_s24  ;;  %2240 = vrot.lane.b32.xlu0 %v1850_v20, %s3545_s28 }
 0x5bc   : > { %3444 = vrot.lane.b32.xlu1 %v3428_v19, %s3545_s28  ;;  %2370 = vrot.lane.b32.xlu0 %v1850_v20, %s3546_s29 }
 0x5c0   : > { %3449 = vrot.lane.b32.xlu1 %v3428_v19, %s3546_s29  ;;  %2308 = vrot.lane.b32.xlu0 %v1854_v13, %s3547_s30  ;;  %v3305_v19 = vld [vmem:[%s4230_s7 + $0x10] sm:$0xf] }
 0x5c4   : > { %2306 = vrot.lane.b32.xlu1 %v1853_v17, %s3547_s30  ;;  %2437 = vperm.xlu0 %3377, %v2434_v27  }
 0x5c8   : > { %2310 = vrot.lane.b32.xlu1 %v1855_v25, %s3547_s30 }
 0x610   : > { %v1862_v28 = vpop.permute.xlu0 %1861 }
 0x616   : > { %v1860_v29 = vpop.permute.xlu1 %1859  ;;  %v3430_v31 = vpop.permute.xlu0 %3429 }
 0x617   : > { %v3432_v32 = vunpack.i.h.bf16 %v3430_v31  ;;  %v3431_v33 = vunpack.i.l.bf16 %v3430_v31  ;;  %v1865_v34 = vsel %vm599_vm7, %v1860_v29, %v1862_v28 }
 0x618   : > { %v1871_v42 = vsel %vm494_vm0, %v1865_v34, 0 }
 0x619   : > { %v1976_v35 = vsel %vm715_vm8, %v3431_v33, %v3432_v32 }
 0x61a   : > { %v1864_v36 = vpop.permute.xlu1 %1863  ;;  %v3435_v38 = vpop.permute.xlu0 %3434  ;;  %v1980_v43 = vsel %vm3709_vm9, %v1976_v35, 0.0 }
 0x61b   : > { %v1866_v39 = vsel %vm599_vm7, %v1862_v28, %v1864_v36  ;;  %v3437_v40 = vunpack.i.h.bf16 %v3435_v38  ;;  %v3436_v41 = vunpack.i.l.bf16 %v3435_v38  ;;  %v1984_v49 = vpack.c.bf16 %v1980_v43, %v1980_v43 }
 0x61c   : > { %3295 = vmatprep.subr.msk.bf16.mxu1 %vm494_vm0, %v1866_v39 }
 0x61d   : > { %1877 = vmatpush1.bf16.msra.mxu1 %v1871_v42  ;;  %v2044_v45 = vsel %vm784_vm10, %v3436_v41, %v3437_v40  ;;  %v1990_v57 = vsel %vm494_vm0, %v1984_v49, 0 }
 0x61e   : > { %v1975_v46 = vpop.permute.xlu1 %1974  ;;  %v2109_v47 = vpop.permute.xlu0 %2108  ;;  %v2048_v51 = vsel %vm3674_vm6, %v2044_v45, 0.0 }
 0x61f   : > { %v1977_v48 = vsel %vm715_vm8, %v3432_v32, %v1975_v46  ;;  %v2052_v58 = vpack.c.bf16 %v2048_v51, %v2048_v51 }
 0x620   : > { %v1981_v50 = vsel %vm3720_vm11, %v1977_v48, 0.0  ;;  %3296 = vmatmul.mubr.msk.bf16.vlgmr.msra.gmra.mrb[36].mxu1 %vm490_vm1, %v3294_v44  ;;  %v3311_v44 = vld [vmem:[%s4230_s7 + $0x18] sm:$0xf] }
 0x621   : > { %v1985_v52 = vpack.c.bf16 %v1981_v50, %v1981_v50  ;;  %2027 = vmatprep.mubr.bf16.mxu1 %v3537_v0  ;;  %v2058_v4 = vsel %vm494_vm0, %v2052_v58, 0 }
 0x622   : > { %v2043_v53 = vpop.permute.xlu1 %2042  ;;  %v2113_v54 = vpop.permute.xlu0 %2112 }
 0x623   : > { %v2045_v56 = vsel %vm784_vm10, %v3437_v40, %v2043_v53  ;;  %3300 = vmatprep.subr.msk.bf16.mxu1 %vm494_vm0, %v1985_v52 }
 0x624   : > { %v2049_v59 = vsel %vm3662_vm5, %v2045_v56, 0.0  ;;  %1996 = vmatpush1.bf16.msra.mxu1 %v1990_v57  ;;  %v3317_v56 = vld [vmem:[%s4230_s7 + $0x20] sm:$0xf] }
 0x625   : > { %v2053_v60 = vpack.c.bf16 %v2049_v59, %v2049_v59 }
 0x626   : > { %v3440_v62 = vpop.permute.xlu1 %3439  ;;  %v2173_v1 = vpop.permute.xlu0 %2172 }
 0x627   : > { %v3442_v2 = vunpack.i.h.bf16 %v3440_v62  ;;  %v3441_v3 = vunpack.i.l.bf16 %v3440_v62  ;;  %3303 = vmatprep.subr.msk.bf16.mxu0 %vm494_vm0, %v2053_v60 }
 0x628   : > { %3301 = vmatmul.mubr.msk.bf16.vlgmr.msra.gmra.mrb[40].mxu1 %vm490_vm1, %v3299_v61  ;;  %2064 = vmatpush1.bf16.msra.mxu0 %v2058_v4 }
 0x629   : > { %v2174_v6 = vsel %vm916_vm12, %v3441_v3, %v3442_v2  ;;  %v2175_v7 = vsel %vm916_vm12, %v3442_v2, %v2173_v1  ;;  %2157 = vmatprep.mubr.bf16.mxu1 %v3537_v0 }
 0x62a   : > { %v2111_v10 = vpop.permute.xlu1 %2110  ;;  %v2179_v11 = vsel %vm3720_vm11, %v2175_v7, 0.0  ;;  %v2178_v12 = vsel %vm3709_vm9, %v2174_v6, 0.0  ;;  %v2241_v18 = vpop.permute.xlu0 %2240 }
 0x62b   : > { %v2114_v13 = vsel %vm855_vm13, %v2109_v47, %v2111_v10  ;;  %v2115_v14 = vsel %vm855_vm13, %v2111_v10, %v2113_v54  ;;  %3304 = vmatmul.mubr.msk.bf16.vlgmr.msra.gmra.mrb[44].mxu0 %vm490_vm1, %v3302_v5  ;;  %v2183_v15 = vpack.c.bf16 %v2179_v11, %v2179_v11  ;;  %v2182_v16 = vpack.c.bf16 %v2178_v12, %v2178_v12  ;;  %v3314_v54 = vld [vmem:[%s4230_s7 + $0x1c] sm:$0xf] }
 0x62c   : > { %v2120_v17 = vsel %vm494_vm0, %v2114_v13, 0  ;;  %3306 = vmatprep.subr.msk.bf16.mxu1 %vm494_vm0, %v2115_v14  ;;  %2225 = vmatprep.mubr.bf16.mxu0 %v3537_v0 }
 0x62d   : > { %2126 = vmatpush1.bf16.msra.mxu1 %v2120_v17  ;;  %3309 = vmatprep.subr.msk.bf16.mxu0 %vm494_vm0, %v2183_v15  ;;  %v2188_v20 = vsel %vm494_vm0, %v2182_v16, 0 }
 0x62e   : > { %v3445_v21 = vpop.permute.xlu1 %3444  ;;  %2194 = vmatpush1.bf16.msra.mxu0 %v2188_v20  ;;  %v2371_v32 = vpop.permute.xlu0 %2370 }
 0x62f   : > { %v3447_v22 = vunpack.i.h.bf16 %v3445_v21  ;;  %v3446_v25 = vunpack.i.l.bf16 %v3445_v21 }
 0x630   : > { %3307 = vmatmul.mubr.msk.bf16.vlgmr.msra.gmra.mrb[44].mxu1 %vm490_vm1, %v3305_v19 }
 0x631   : > { %v2242_v27 = vsel %vm985_vm14, %v3446_v25, %v3447_v22  ;;  %v2243_v28 = vsel %vm985_vm14, %v3447_v22, %v2241_v18  ;;  %2293 = vmatprep.mubr.bf16.mxu1 %v3537_v0 }
 0x632   : > { %v2247_v29 = vsel %vm3662_vm5, %v2243_v28, 0.0  ;;  %v3450_v31 = vpop.permute.xlu1 %3449  ;;  %v2246_v33 = vsel %vm3674_vm6, %v2242_v27, 0.0  ;;  %v2309_v48 = vpop.permute.xlu0 %2308 }
 0x633   : > { %v2251_v34 = vpack.c.bf16 %v2247_v29, %v2247_v29  ;;  %v3452_v35 = vunpack.i.h.bf16 %v3450_v31  ;;  %v3451_v36 = vunpack.i.l.bf16 %v3450_v31  ;;  %3310 = vmatmul.mubr.msk.bf16.vlgmr.msra.gmra.mrb[48].mxu0 %vm490_vm1, %v3308_v26  ;;  %v2250_v38 = vpack.c.bf16 %v2246_v33, %v2246_v33 }
 0x634   : > { %2355 = vmatprep.mubr.bf16.mxu0 %v3537_v0 }
 0x635   : > { %v2372_v39 = vsel %vm1117_vm15, %v3451_v36, %v3452_v35  ;;  %v2373_v40 = vsel %vm1117_vm15, %v3452_v35, %v2371_v32  ;;  %3312 = vmatprep.subr.msk.bf16.mxu1 %vm494_vm0, %v2251_v34  ;;  %v2256_v41 = vsel %vm494_vm0, %v2250_v38, 0 }
 0x636   : > { %v2377_v42 = vsel %vm3720_vm11, %v2373_v40, 0.0  ;;  %v2307_v43 = vpop.permute.xlu1 %2306  ;;  %2262 = vmatpush1.bf16.msra.mxu1 %v2256_v41  ;;  %v2376_v45 = vsel %vm3709_vm9, %v2372_v39, 0.0 }
 0x637   : > { %v2381_v46 = vpack.c.bf16 %v2377_v42, %v2377_v42  ;;  %v2380_v47 = vpack.c.bf16 %v2376_v45, %v2376_v45  ;;  %v2312_v49 = vsel %vm1056_vm2, %v2307_v43, %v2309_v48 }
 0x638   : > { %v2318_v53 = vsel %vm494_vm0, %v2312_v49, 0 }
 0x639   : > { %3313 = vmatmul.mubr.msk.bf16.vlgmr.msra.gmra.mrb[48].mxu1 %vm490_vm1, %v3311_v44  ;;  %3318 = vmatprep.subr.msk.bf16.mxu1 %vm494_vm0, %v2381_v46  ;;  %v2386_v50 = vsel %vm494_vm0, %v2380_v47, 0 }
 0x63a   : > { %v2311_v51 = vpop.permute.xlu1 %2310  ;;  %2392 = vmatpush1.bf16.msra.mxu1 %v2386_v50  ;;  %2423 = vmatprep.mubr.bf16.mxu1 %v3537_v0 }
 0x63b   : > { %v2313_v52 = vsel %vm1056_vm2, %v2309_v48, %v2311_v51 }
 0x63c   : > { %3315 = vmatprep.subr.msk.bf16.mxu0 %vm494_vm0, %v2313_v52 }
 0x63d   : > { %2324 = vmatpush1.bf16.msra.mxu0 %v2318_v53 }
 0x640   : > { %3316 = vmatmul.mubr.msk.bf16.vlgmr.msra.gmra.mrb[52].mxu0 %vm490_vm1, %v3314_v54 }
 0x641   : > { %3319 = vmatmul.mubr.msk.bf16.vlgmr.msra.gmra.mrb[52].mxu1 %vm490_vm1, %v3317_v56  ;;  %2534 = vmatprep.mubr.bf16.mxu0 %v3537_v0 }
 0x642   : > { %2584 = vmatprep.mubr.bf16.mxu1 %v3537_v0 }
 0x643   : > { %v2438_v51 = vpop.permute.xlu0 %2437 }
 0x67c   : > { %v1960_v57 = vpop.f32.mrb[40].mxu0 }
 0x67d   : > { %v1962_v58 = vpop.f32.mrb[41].mxu0 }
 0x67e   : > { %v1964_v59 = vpop.f32.mrb[42].mxu0 }
 0x67f   : > { %v1965_v60 = vpop.f32.mrb[43].mxu0 }
 0x6f3   : > { %v1910_v61 = vpop.f32.mrb[36].mxu1 }
 0x6f4   : > { %v1912_v62 = vpop.f32.mrb[37].mxu1  ;;  %v1961_v1 = vadd.f32 %v1960_v57, %v1910_v61 }
 0x6f5   : > { %v1914_v2 = vpop.f32.mrb[38].mxu1  ;;  %v1963_v3 = vadd.f32 %v1962_v58, %v1912_v62 }
 0x6f6   : > { %v1915_v4 = vpop.f32.mrb[39].mxu1 }
 0x6fb   : > { %v2029_v5 = vpop.f32.mrb[40].mxu1 }
 0x6fc   : > { %v2036_v6 = vadd.f32 %v2029_v5, %v1961_v1  ;;  %v2031_v7 = vpop.f32.mrb[41].mxu1 }
 0x6fd   : > { %v2037_v10 = vadd.f32 %v2031_v7, %v1963_v3  ;;  %v2033_v11 = vpop.f32.mrb[42].mxu1 }
 0x6fe   : > { %v2034_v12 = vpop.f32.mrb[43].mxu1  ;;  %v2097_v13 = vpop.f32.mrb[44].mxu0 }
 0x6ff   : > { %v2104_v14 = vadd.f32 %v2097_v13, %v2036_v6  ;;  %v2099_v15 = vpop.f32.mrb[45].mxu0 }
 0x700   : > { %v2105_v16 = vadd.f32 %v2099_v15, %v2037_v10  ;;  %v2101_v17 = vpop.f32.mrb[46].mxu0 }
 0x701   : > { %v2102_v18 = vpop.f32.mrb[47].mxu0 }
 0x703   : > { %v2159_v19 = vpop.f32.mrb[44].mxu1 }
 0x704   : > { %v2166_v20 = vadd.f32 %v2159_v19, %v2104_v14  ;;  %v2161_v21 = vpop.f32.mrb[45].mxu1 }
 0x705   : > { %v2167_v22 = vadd.f32 %v2161_v21, %v2105_v16  ;;  %v2163_v25 = vpop.f32.mrb[46].mxu1  ;;  %v2473_v21 = vld [vmem:[%s4232_s9] sm:$0xf] }
 0x706   : > { %v2164_v26 = vpop.f32.mrb[47].mxu1  ;;  %v2227_v27 = vpop.f32.mrb[48].mxu0 }
 0x707   : > { %v2234_v28 = vadd.f32 %v2227_v27, %v2166_v20  ;;  %v2229_v29 = vpop.f32.mrb[49].mxu0 }
 0x708   : > { %v2235_v31 = vadd.f32 %v2229_v29, %v2167_v22  ;;  %v2231_v32 = vpop.f32.mrb[50].mxu0  ;;  %v3060_v22 = vld [vmem:[%s4233_s10] sm:$0xff] }
 0x709   : > { %v2232_v33 = vpop.f32.mrb[51].mxu0 }
 0x70c   : > { %v2295_v34 = vpop.f32.mrb[48].mxu1 }
 0x70d   : > { %v2302_v35 = vadd.f32 %v2295_v34, %v2234_v28  ;;  %v2297_v36 = vpop.f32.mrb[49].mxu1 }
 0x70e   : > { %v2303_v38 = vadd.f32 %v2297_v36, %v2235_v31  ;;  %v2299_v39 = vpop.f32.mrb[50].mxu1 }
 0x70f   : > { %v2300_v40 = vpop.f32.mrb[51].mxu1 }
 0x713   : > { %v2357_v41 = vpop.f32.mrb[52].mxu0 }
 0x714   : > { %v2364_v42 = vadd.f32 %v2357_v41, %v2302_v35  ;;  %v2359_v43 = vpop.f32.mrb[53].mxu0  ;;  %v2425_v44 = vpop.f32.mrb[52].mxu1  ;;  %v3322_v41 = vld [vmem:[%s4232_s9 + $0x4] sm:$0xf] }
 0x715   : > { %v2365_v45 = vadd.f32 %v2359_v43, %v2303_v38  ;;  %v2361_v46 = vpop.f32.mrb[54].mxu0  ;;  %v2427_v47 = vpop.f32.mrb[53].mxu1 }
 0x716   : > { %v2432_v48 = vadd.f32 %v2425_v44, %v2364_v42  ;;  %v2362_v49 = vpop.f32.mrb[55].mxu0  ;;  %v2429_v50 = vpop.f32.mrb[54].mxu1 }
 0x717   : > { %v2433_v52 = vadd.f32 %v2427_v47, %v2365_v45  ;;  %v2430_v53 = vpop.f32.mrb[55].mxu1 }
 0x718   : > { %v2440_v54 = vadd.f32 %v2438_v51, %v2432_v48 }
 0x719   : > { %v2441_v56 = vadd.f32 %v2438_v51, %v2433_v52 }
 0x71a   : > { %v3320_v57 = vmul.f32 -1.442695, %v2440_v54 }
 0x71b   : > { %v3321_v58 = vmul.f32 -1.442695, %v2441_v56 }
 0x71c   : > { %3505 = vpow2.f32 %v3320_v57 }
 0x71d   : > { %3507 = vpow2.f32 %v3321_v58  ;;  %v3327_v58 = vld [vmem:[%s4232_s9 + $0x8] sm:$0xf] }
 0x726   : > { %v3506_v59 = vpop.eup %3505 }
 0x727   : > { %v3508_v60 = vpop.eup %3507  ;;  %v2448_v61 = vadd.f32 1.0, %v3506_v59 }
 0x728   : > { %v2449_v62 = vadd.f32 1.0, %v3508_v60 }
 0x729   : > { %3509 = vrcp.f32 %v2448_v61 }
 0x72a   : > { %3511 = vrcp.f32 %v2449_v62 }
 0x733   : > { %v3510_v1 = vpop.eup %3509 }
 0x734   : > { %v3512_v2 = vpop.eup %3511  ;;  %v2454_v3 = vmul.f32 %v3510_v1, %v2440_v54 }
 0x735   : > { %v2455_v4 = vmul.f32 %v3512_v2, %v2441_v56  ;;  %v3330_v2 = vld [vmem:[%s4232_s9 + $0xc] sm:$0xf] }
 0x736   : > { %2458 = vrot.lane.b32.xlu1 %v2454_v3, %s3539_s18 }
 0x737   : > { %2460 = vrot.lane.b32.xlu0 %v2455_v4, %s3539_s18 }
 0x7a8   : > { %v2459_v5 = vpop.permute.xlu1 %2458 }
 0x7a9   : > { %2466 = vst.msk [vmem:[#allocation3] sm:$0xff] %vm569_vm3, %v2459_v5  ;;  %v2461_v6 = vpop.permute.xlu0 %2460 }
 0x7aa   : > { %v2462_v7 = vsel %vm564_vm4, %v2459_v5, %v2461_v6  ;;  %2468 = vst.msk [vmem:[#allocation3 + $0x10] sm:$0xff] %vm564_vm4, %v2461_v6 }
 0x7ab   : > { %v2480_v10 = vpack.c.bf16 %v2462_v7, %v2462_v7  ;;  %v2472_v11 = vsel %vm3662_vm5, %v2462_v7, 0.0 }
 0x7ac   : > { %v2475_v12 = vpack.c.bf16 %v2472_v11, %v2472_v11 }
 0x7ad   : > { %2487 = vrot.lane.b32.xlu0 %v2480_v10, %s3540_s19 }
 0x7ae   : > { %3325 = vmatprep.subr.msk.bf16.mxu1 %vm494_vm0, %v2475_v12 }
 0x7b0   : > { %v2469_v13 = vld [vmem:[#allocation3] sm:$0xff] }
 0x7b1   : > { %v2479_v14 = vpack.c.bf16 %v2469_v13, %v2469_v13  ;;  %v2471_v15 = vsel %vm3674_vm6, %v2469_v13, 0.0  ;;  %v3453_v16 = vpack.i.bf16 %v2462_v7, %v2469_v13  ;;  %v2476_v17 = vld [vmem:[#allocation3 + $0x10] sm:$0xff] }
 0x7b2   : > { %v2474_v18 = vpack.c.bf16 %v2471_v15, %v2471_v15  ;;  %v2481_v20 = vpack.c.bf16 %v2476_v17, %v2476_v17 }
 0x7b3   : > { %2485 = vrot.lane.b32.xlu1 %v2479_v14, %s3540_s19  ;;  %3454 = vrot.lane.b32.xlu0 %v3453_v16, %s3541_s20 }
 0x7b4   : > { %v2547_v19 = vsel %vm494_vm0, %v2474_v18, 0 }
 0x7b5   : > { %2553 = vmatpush1.bf16.msra.mxu1 %v2547_v19 }
 0x7b7   : > { %2489 = vrot.lane.b32.xlu1 %v2481_v20, %s3540_s19  ;;  %3459 = vrot.lane.b32.xlu0 %v3453_v16, %s3542_s23 }
 0x7b8   : > { %3326 = vmatmul.mubr.msk.bf16.vlgmr.msra.gmra.mrb[56].mxu1 %vm490_vm1, %v2473_v21  ;;  %v3336_v21 = vld [vmem:[%s4232_s9 + $0x14] sm:$0xf] }
 0x7b9   : > { %2721 = vmatprep.mubr.bf16.mxu1 %v3537_v0 }
 0x7bb   : > { %2600 = vrot.lane.b32.xlu1 %v2476_v17, %s3541_s20  ;;  %2734 = vrot.lane.b32.xlu0 %v2479_v14, %s3543_s24 }
 0x7bf   : > { %2668 = vrot.lane.b32.xlu1 %v2476_v17, %s3542_s23  ;;  %2738 = vrot.lane.b32.xlu0 %v2481_v20, %s3543_s24 }
 0x7c3   : > { %3464 = vrot.lane.b32.xlu1 %v3453_v16, %s3544_s27  ;;  %2798 = vrot.lane.b32.xlu0 %v2476_v17, %s3544_s27 }
 0x7c7   : > { %2736 = vrot.lane.b32.xlu1 %v2480_v10, %s3543_s24  ;;  %2866 = vrot.lane.b32.xlu0 %v2476_v17, %s3545_s28 }
 0x7cb   : > { %3469 = vrot.lane.b32.xlu1 %v3453_v16, %s3545_s28  ;;  %2996 = vrot.lane.b32.xlu0 %v2476_v17, %s3546_s29 }
 0x7cf   : > { %3474 = vrot.lane.b32.xlu1 %v3453_v16, %s3546_s29  ;;  %2934 = vrot.lane.b32.xlu0 %v2480_v10, %s3547_s30  ;;  %v3333_v16 = vld [vmem:[%s4232_s9 + $0x10] sm:$0xf] }
 0x7d3   : > { %2932 = vrot.lane.b32.xlu1 %v2479_v14, %s3547_s30  ;;  %3063 = vperm.xlu0 %3377, %v3060_v22  }
 0x7d7   : > { %2936 = vrot.lane.b32.xlu1 %v2481_v20, %s3547_s30  ;;  %s3357_s30 = sshll.u32 %s4246_s26, 4 }
 0x7d8   : > { %s440_s15 = scalar_lea.vmem %s4236_s13, %s3357_s30 }
 0x81f   : > { %v2488_v25 = vpop.permute.xlu0 %2487 }
 0x825   : > { %v2486_v26 = vpop.permute.xlu1 %2485  ;;  %v3455_v27 = vpop.permute.xlu0 %3454 }
 0x826   : > { %v3457_v28 = vunpack.i.h.bf16 %v3455_v27  ;;  %v3456_v29 = vunpack.i.l.bf16 %v3455_v27  ;;  %v2491_v31 = vsel %vm599_vm7, %v2486_v26, %v2488_v25 }
 0x827   : > { %v2497_v39 = vsel %vm494_vm0, %v2491_v31, 0 }
 0x828   : > { %v2602_v32 = vsel %vm715_vm8, %v3456_v29, %v3457_v28 }
 0x829   : > { %v2490_v33 = vpop.permute.xlu1 %2489  ;;  %v3460_v34 = vpop.permute.xlu0 %3459  ;;  %v2606_v40 = vsel %vm3709_vm9, %v2602_v32, 0.0 }
 0x82a   : > { %v2492_v35 = vsel %vm599_vm7, %v2488_v25, %v2490_v33  ;;  %v3462_v36 = vunpack.i.h.bf16 %v3460_v34  ;;  %v3461_v38 = vunpack.i.l.bf16 %v3460_v34  ;;  %v2610_v46 = vpack.c.bf16 %v2606_v40, %v2606_v40 }
 0x82b   : > { %3323 = vmatprep.subr.msk.bf16.mxu0 %vm494_vm0, %v2492_v35 }
 0x82c   : > { %2503 = vmatpush1.bf16.msra.mxu0 %v2497_v39  ;;  %v2670_v42 = vsel %vm784_vm10, %v3461_v38, %v3462_v36  ;;  %v2616_v53 = vsel %vm494_vm0, %v2610_v46, 0  ;;  %v3339_v39 = vld [vmem:[%s4232_s9 + $0x18] sm:$0xf] }
 0x82d   : > { %v2601_v43 = vpop.permute.xlu1 %2600  ;;  %v2735_v44 = vpop.permute.xlu0 %2734  ;;  %v2674_v48 = vsel %vm3674_vm6, %v2670_v42, 0.0 }
 0x82e   : > { %v2603_v45 = vsel %vm715_vm8, %v3457_v28, %v2601_v43  ;;  %v2678_v54 = vpack.c.bf16 %v2674_v48, %v2674_v48  ;;  %v3342_v48 = vld [vmem:[%s4232_s9 + $0x1c] sm:$0xf] }
 0x82f   : > { %v2607_v47 = vsel %vm3720_vm11, %v2603_v45, 0.0  ;;  %3324 = vmatmul.mubr.msk.bf16.vlgmr.msra.gmra.mrb[56].mxu0 %vm490_vm1, %v3322_v41 }
 0x830   : > { %v2611_v49 = vpack.c.bf16 %v2607_v47, %v2607_v47  ;;  %2653 = vmatprep.mubr.bf16.mxu0 %v3537_v0  ;;  %v2684_v1 = vsel %vm494_vm0, %v2678_v54, 0  ;;  %v3092_v47 = vpack.c.bf16 %v3941_v9, %v3648_v24 }
 0x831   : > { %v2669_v50 = vpop.permute.xlu1 %2668  ;;  %v2739_v51 = vpop.permute.xlu0 %2738 }
 0x832   : > { %v2671_v52 = vsel %vm784_vm10, %v3462_v36, %v2669_v50  ;;  %3328 = vmatprep.subr.msk.bf16.mxu0 %vm494_vm0, %v2611_v49  ;;  %v3345_v49 = vld [vmem:[%s4232_s9 + $0x20] sm:$0xf]  ;;  %v3091_v50 = vpack.c.bf16 %v3939_v8, %v3646_v23 }
 0x833   : > { %v2675_v56 = vsel %vm3662_vm5, %v2671_v52, 0.0  ;;  %2622 = vmatpush1.bf16.msra.mxu0 %v2616_v53  ;;  %v3095_v53 = vld [vmem:[%s4235_s12] sm:$0xff] }
 0x834   : > { %v2679_v57 = vpack.c.bf16 %v2675_v56, %v2675_v56  ;;  %3098 = vperm.xlu1 %3478, %v3095_v53  }
 0x835   : > { %v3465_v59 = vpop.permute.xlu1 %3464  ;;  %v2799_v60 = vpop.permute.xlu0 %2798 }
 0x836   : > { %v3467_v61 = vunpack.i.h.bf16 %v3465_v59  ;;  %v3466_v62 = vunpack.i.l.bf16 %v3465_v59  ;;  %3331 = vmatprep.subr.msk.bf16.mxu1 %vm494_vm0, %v2679_v57 }
 0x837   : > { %3329 = vmatmul.mubr.msk.bf16.vlgmr.msra.gmra.mrb[60].mxu0 %vm490_vm1, %v3327_v58  ;;  %2690 = vmatpush1.bf16.msra.mxu1 %v2684_v1 }
 0x838   : > { %v2800_v3 = vsel %vm916_vm12, %v3466_v62, %v3467_v61  ;;  %v2801_v4 = vsel %vm916_vm12, %v3467_v61, %v2799_v60  ;;  %2783 = vmatprep.mubr.bf16.mxu0 %v3537_v0 }
 0x839   : > { %v2737_v5 = vpop.permute.xlu1 %2736  ;;  %v2805_v6 = vsel %vm3720_vm11, %v2801_v4, 0.0  ;;  %v2804_v7 = vsel %vm3709_vm9, %v2800_v3, 0.0  ;;  %v2867_v15 = vpop.permute.xlu0 %2866 }
 0x83a   : > { %v2740_v10 = vsel %vm855_vm13, %v2735_v44, %v2737_v5  ;;  %v2741_v11 = vsel %vm855_vm13, %v2737_v5, %v2739_v51  ;;  %3332 = vmatmul.mubr.msk.bf16.vlgmr.msra.gmra.mrb[60].mxu1 %vm490_vm1, %v3330_v2  ;;  %v2809_v12 = vpack.c.bf16 %v2805_v6, %v2805_v6  ;;  %v2808_v13 = vpack.c.bf16 %v2804_v7, %v2804_v7 }
 0x83b   : > { %v2746_v14 = vsel %vm494_vm0, %v2740_v10, 0  ;;  %3334 = vmatprep.subr.msk.bf16.mxu0 %vm494_vm0, %v2741_v11  ;;  %2851 = vmatprep.mubr.bf16.mxu1 %v3537_v0 }
 0x83c   : > { %2752 = vmatpush1.bf16.msra.mxu0 %v2746_v14  ;;  %3337 = vmatprep.subr.msk.bf16.mxu1 %vm494_vm0, %v2809_v12  ;;  %v2814_v17 = vsel %vm494_vm0, %v2808_v13, 0 }
 0x83d   : > { %v3470_v18 = vpop.permute.xlu1 %3469  ;;  %2820 = vmatpush1.bf16.msra.mxu1 %v2814_v17  ;;  %v2997_v28 = vpop.permute.xlu0 %2996 }
 0x83e   : > { %v3472_v19 = vunpack.i.h.bf16 %v3470_v18  ;;  %v3471_v20 = vunpack.i.l.bf16 %v3470_v18 }
 0x83f   : > { %3335 = vmatmul.mubr.msk.bf16.vlgmr.msra.gmra.mrb[64].mxu0 %vm490_vm1, %v3333_v16 }
 0x840   : > { %v2868_v22 = vsel %vm985_vm14, %v3471_v20, %v3472_v19  ;;  %v2869_v25 = vsel %vm985_vm14, %v3472_v19, %v2867_v15  ;;  %2919 = vmatprep.mubr.bf16.mxu0 %v3537_v0 }
 0x841   : > { %v2873_v26 = vsel %vm3662_vm5, %v2869_v25, 0.0  ;;  %v3475_v27 = vpop.permute.xlu1 %3474  ;;  %v2872_v29 = vsel %vm3674_vm6, %v2868_v22, 0.0  ;;  %v2935_v43 = vpop.permute.xlu0 %2934 }
 0x842   : > { %v2877_v31 = vpack.c.bf16 %v2873_v26, %v2873_v26  ;;  %v3477_v32 = vunpack.i.h.bf16 %v3475_v27  ;;  %v3476_v33 = vunpack.i.l.bf16 %v3475_v27  ;;  %3338 = vmatmul.mubr.msk.bf16.vlgmr.msra.gmra.mrb[64].mxu1 %vm490_vm1, %v3336_v21  ;;  %v2876_v34 = vpack.c.bf16 %v2872_v29, %v2872_v29 }
 0x843   : > { %2981 = vmatprep.mubr.bf16.mxu1 %v3537_v0 }
 0x844   : > { %v2998_v35 = vsel %vm1117_vm15, %v3476_v33, %v3477_v32  ;;  %v2999_v36 = vsel %vm1117_vm15, %v3477_v32, %v2997_v28  ;;  %3340 = vmatprep.subr.msk.bf16.mxu0 %vm494_vm0, %v2877_v31  ;;  %v2882_v30 = vsel %vm494_vm0, %v2876_v34, 0 }
 0x845   : > { %v3003_v37 = vsel %vm3720_vm11, %v2999_v36, 0.0  ;;  %v2933_v38 = vpop.permute.xlu1 %2932  ;;  %2888 = vmatpush1.bf16.msra.mxu0 %v2882_v30  ;;  %v3002_v40 = vsel %vm3709_vm9, %v2998_v35, 0.0 }
 0x846   : > { %v3007_v41 = vpack.c.bf16 %v3003_v37, %v3003_v37  ;;  %v3006_v42 = vpack.c.bf16 %v3002_v40, %v3002_v40  ;;  %v2938_v44 = vsel %vm1056_vm2, %v2933_v38, %v2935_v43 }
 0x847   : > { %v2944_v55 = vsel %vm494_vm0, %v2938_v44, 0 }
 0x848   : > { %3341 = vmatmul.mubr.msk.bf16.vlgmr.msra.gmra.mrb[68].mxu0 %vm490_vm1, %v3339_v39  ;;  %3346 = vmatprep.subr.msk.bf16.mxu0 %vm494_vm0, %v3007_v41  ;;  %v3012_v63 = vsel %vm494_vm0, %v3006_v42, 0 }
 0x849   : > { %v2937_v45 = vpop.permute.xlu1 %2936  ;;  %3018 = vmatpush1.bf16.msra.mxu0 %v3012_v63  ;;  %3049 = vmatprep.mubr.bf16.mxu0 %v3537_v0 }
 0x84a   : > { %v2939_v46 = vsel %vm1056_vm2, %v2935_v43, %v2937_v45 }
 0x84b   : > { %3343 = vmatprep.subr.msk.bf16.mxu1 %vm494_vm0, %v2939_v46 }
 0x84c   : > { %2950 = vmatpush1.bf16.msra.mxu1 %v2944_v55 }
 0x84d   : > { %3111 = vmatprep.subr.bf16.mxu1 %v3092_v47 }
 0x84f   : > { %3344 = vmatmul.mubr.msk.bf16.vlgmr.msra.gmra.mrb[68].mxu1 %vm490_vm1, %v3342_v48 }
 0x850   : > { %3112 = vmatpush1.bf16.msra.mxu1 %v3091_v50  ;;  %3347 = vmatmul.mubr.msk.bf16.vlgmr.msra.gmra.mrb[72].mxu0 %vm490_vm1, %v3345_v49  ;;  %vm3101_vm1 = vcmask 195584  }
 0x851   : > { %3143 = vmatprep.mubr.bf16.mxu1 %v3537_v0 }
 0x852   : > { %v3064_v40 = vpop.permute.xlu0 %3063 }
 0x88b   : > { %v2586_v24 = vpop.f32.mrb[56].mxu1 }
 0x88c   : > { %v2588_v9 = vpop.f32.mrb[57].mxu1 }
 0x88d   : > { %v2590_v51 = vpop.f32.mrb[58].mxu1 }
 0x88e   : > { %v2591_v52 = vpop.f32.mrb[59].mxu1 }
 0x902   : > { %v2536_v54 = vpop.f32.mrb[56].mxu0 }
 0x903   : > { %v2538_v56 = vpop.f32.mrb[57].mxu0  ;;  %v2587_v57 = vadd.f32 %v2586_v24, %v2536_v54  ;;  %v3090_v54 = vld [vmem:[%s4234_s11] sm:$0xf] }
 0x904   : > { %v2540_v23 = vpop.f32.mrb[58].mxu0  ;;  %v2589_v8 = vadd.f32 %v2588_v9, %v2538_v56  ;;  %v3099_v56 = vpop.permute.xlu1 %3098 }
 0x905   : > { %v2541_v58 = vpop.f32.mrb[59].mxu0 }
 0x90a   : > { %v2655_v59 = vpop.f32.mrb[60].mxu0 }
 0x90b   : > { %v2662_v60 = vadd.f32 %v2655_v59, %v2587_v57  ;;  %v2657_v61 = vpop.f32.mrb[61].mxu0 }
 0x90c   : > { %v2663_v62 = vadd.f32 %v2657_v61, %v2589_v8  ;;  %v2659_v0 = vpop.f32.mrb[62].mxu0 }
 0x90d   : > { %v2723_v1 = vpop.f32.mrb[60].mxu1  ;;  %v2660_v2 = vpop.f32.mrb[63].mxu0 }
 0x90e   : > { %v2730_v3 = vadd.f32 %v2723_v1, %v2662_v60  ;;  %v2725_v4 = vpop.f32.mrb[61].mxu1 }
 0x90f   : > { %v2731_v5 = vadd.f32 %v2725_v4, %v2663_v62  ;;  %v2727_v6 = vpop.f32.mrb[62].mxu1 }
 0x910   : > { %v2728_v7 = vpop.f32.mrb[63].mxu1 }
 0x912   : > { %v2785_v10 = vpop.f32.mrb[64].mxu0 }
 0x913   : > { %v2792_v11 = vadd.f32 %v2785_v10, %v2730_v3  ;;  %v2787_v12 = vpop.f32.mrb[65].mxu0 }
 0x914   : > { %v2793_v13 = vadd.f32 %v2787_v12, %v2731_v5  ;;  %v2789_v14 = vpop.f32.mrb[66].mxu0 }
 0x915   : > { %v2853_v15 = vpop.f32.mrb[64].mxu1  ;;  %v2790_v16 = vpop.f32.mrb[67].mxu0 }
 0x916   : > { %v2860_v17 = vadd.f32 %v2853_v15, %v2792_v11  ;;  %v2855_v18 = vpop.f32.mrb[65].mxu1 }
 0x917   : > { %v2861_v19 = vadd.f32 %v2855_v18, %v2793_v13  ;;  %v2857_v20 = vpop.f32.mrb[66].mxu1 }
 0x918   : > { %v2858_v21 = vpop.f32.mrb[67].mxu1 }
 0x91b   : > { %v2921_v22 = vpop.f32.mrb[68].mxu0 }
 0x91c   : > { %v2928_v25 = vadd.f32 %v2921_v22, %v2860_v17  ;;  %v2923_v26 = vpop.f32.mrb[69].mxu0 }
 0x91d   : > { %v2929_v27 = vadd.f32 %v2923_v26, %v2861_v19  ;;  %v2925_v28 = vpop.f32.mrb[70].mxu0 }
 0x91e   : > { %v2926_v29 = vpop.f32.mrb[71].mxu0 }
 0x922   : > { %v2983_v31 = vpop.f32.mrb[68].mxu1 }
 0x923   : > { %v2990_v32 = vadd.f32 %v2983_v31, %v2928_v25  ;;  %v2985_v33 = vpop.f32.mrb[69].mxu1  ;;  %v3051_v34 = vpop.f32.mrb[72].mxu0 }
 0x924   : > { %v2991_v35 = vadd.f32 %v2985_v33, %v2929_v27  ;;  %v2987_v36 = vpop.f32.mrb[70].mxu1  ;;  %v3053_v30 = vpop.f32.mrb[73].mxu0 }
 0x925   : > { %v3058_v37 = vadd.f32 %v3051_v34, %v2990_v32  ;;  %v2988_v38 = vpop.f32.mrb[71].mxu1  ;;  %v3055_v39 = vpop.f32.mrb[74].mxu0 }
 0x926   : > { %v3059_v41 = vadd.f32 %v3053_v30, %v2991_v35  ;;  %v3056_v42 = vpop.f32.mrb[75].mxu0 }
 0x927   : > { %v3066_v43 = vadd.f32 %v3064_v40, %v3058_v37 }
 0x928   : > { %v3067_v44 = vadd.f32 %v3064_v40, %v3059_v41 }
 0x929   : > { %v3348_v63 = vmul.f32 -1.442695, %v3066_v43 }
 0x92a   : > { %v3349_v45 = vmul.f32 -1.442695, %v3067_v44 }
 0x92b   : > { %3513 = vpow2.f32 %v3348_v63 }
 0x92c   : > { %3515 = vpow2.f32 %v3349_v45 }
 0x935   : > { %v3514_v46 = vpop.eup %3513 }
 0x936   : > { %v3516_v55 = vpop.eup %3515  ;;  %v3074_v47 = vadd.f32 1.0, %v3514_v46 }
 0x937   : > { %v3075_v48 = vadd.f32 1.0, %v3516_v55 }
 0x938   : > { %3517 = vrcp.f32 %v3074_v47 }
 0x939   : > { %3519 = vrcp.f32 %v3075_v48 }
 0x942   : > { %v3518_v49 = vpop.eup %3517 }
 0x943   : > { %v3520_v50 = vpop.eup %3519  ;;  %v3080_v24 = vmul.f32 %v3518_v49, %v3066_v43 }
 0x944   : > { %v3081_v9 = vmul.f32 %v3520_v50, %v3067_v44 }
 0x945   : > { %v3093_v51 = vpack.c.bf16 %v3080_v24, %v3080_v24 }
 0x946   : > { %v3094_v52 = vpack.c.bf16 %v3081_v9, %v3081_v9 }
 0x947   : > { %v3106_v53 = vsel %vm494_vm0, %v3093_v51, 0 }
 0x948   : > { %3350 = vmatprep.subr.msk.bf16.mxu1 %vm494_vm0, %v3094_v52 }
 0x949   : > { %3114 = vmatpush1.bf16.msra.mxu1 %v3106_v53 }
 0x94c   : > { %3351 = vmatmul.mubr.msk.bf16.vlgmr.msra.gmra.mrb[72].mxu1 %vm3101_vm1, %v3090_v54 }
 0xa1f   : > { %v3145_v57 = vpop.f32.mrb[72].mxu1 }
 0xa20   : > { %v3146_v23 = vadd.f32 %v3145_v57, %v3099_v56  ;;  %v3147_v8 = vpop.f32.mrb[73].mxu1 }
 0xa21   : > { %v3148_v58 = vadd.f32 %v3147_v8, %v3099_v56  ;;  %v3149_v59 = vpop.f32.mrb[74].mxu1 }
 0xa22   : > { %v3352_v60 = vmul.f32 -1.442695, %v3146_v23  ;;  %v3150_v61 = vpop.f32.mrb[75].mxu1 }
 0xa23   : > { %v3353_v62 = vmul.f32 -1.442695, %v3148_v58 }
 0xa24   : > { %3521 = vpow2.f32 %v3352_v60 }
 0xa25   : > { %3523 = vpow2.f32 %v3353_v62 }
 0xa2e   : > { %v3522_v0 = vpop.eup %3521 }
 0xa2f   : > { %v3524_v1 = vpop.eup %3523  ;;  %v3158_v2 = vadd.f32 1.0, %v3522_v0 }
 0xa30   : > { %v3159_v3 = vadd.f32 1.0, %v3524_v1 }
 0xa31   : > { %3525 = vrcp.f32 %v3158_v2 }
 0xa32   : > { %3527 = vrcp.f32 %v3159_v3 }
 0xa3b   : > { %v3526_v4 = vpop.eup %3525 }
 0xa3c   : > { %v3528_v5 = vpop.eup %3527  ;;  %v3164_v6 = vmul.f32 %v3526_v4, %v3146_v23 }
 0xa3d   : > { %v3165_v7 = vmul.f32 %v3528_v5, %v3148_v58 }
 0xa3e   : > { %3166 = vst [vmem:[%s440_s15] sm:$0xff] %v3164_v6 }
 0xa3f   : > { %3167 = vst [vmem:[%s440_s15 + $0x8] sm:$0xff] %v3165_v7 }
 0xa40 PF: > { %s23_s25 = sadd.s32 1, %s3535_s25  }
 0xa41   : > { %p20_p4 = scmp.ge.s32.totalorder %s23_s25, 4  }
 0xa43   :  { %22 = sbr.rel (!%p20_p4) target bundleno = 1 (0x1), region = 134 }

</bundles_post_ra>
